<compile_context>
chip_gen: v7x
topology: tpu7x:2x2x1
jax: 0.10.0
libtpu: 0.0.40
codegen_flags: <defaults>
</compile_context>

<pallas_src>
import functools
import math

import jax
import jax.numpy as jnp
from jax import lax
from jax.experimental import pallas as pl
from jax.experimental.pallas import tpu as pltpu


def _flash_attn_kernel(
    qi_map_ref, ki_map_ref,        # scalar prefetch (SMEM): step -> q-block / kv-block index
    q_ref, k_ref, v_ref,           # inputs: (1, H, blk, head_dim) VMEM tiles
    o_ref,                         # output: (1, H, blk, head_dim)
    m_buf, l_buf, acc_buf,         # VMEM scratch: running max / sum / accumulator (f32)
    *, block, compute_dtype,
):
    f32 = jnp.float32
    step = pl.program_id(1)
    qi = qi_map_ref[step]
    ki = ki_map_ref[step]
    approx = jnp.dtype(compute_dtype) != jnp.dtype(jnp.float32)

    # ---------------- init: first kv block of each q row ----------------
    @pl.when(ki == 0)
    def _init():
        m_buf[...] = jnp.full_like(m_buf, -jnp.inf)
        l_buf[...] = jnp.zeros_like(l_buf)
        acc_buf[...] = jnp.zeros_like(acc_buf)

    def _update(masked):
        q = q_ref[0]                                                    # (H, blk, hd)
        k = k_ref[0]                                                    # (H, blk, hd)
        v = v_ref[0]                                                    # (H, blk, hd)
        # Head-batched scores; contraction over head_dim handles k's "transpose" on the MXU.
        s = lax.dot_general(q, k,
                            dimension_numbers=(((2,), (2,)), ((0,), (0,))),
                            preferred_element_type=f32)                 # (H, blk, blk) f32
        if masked:
            # Diagonal block only (qi == ki and square blocks -> purely local mask).
            row = lax.broadcasted_iota(jnp.int32, (block, block), 0)
            col = lax.broadcasted_iota(jnp.int32, (block, block), 1)
            s = jnp.where((col <= row)[None, :, :], s, -jnp.inf)
        # Online softmax update — statistics and accumulation stay in f32.
        m_prev = m_buf[...]                                             # (H, blk, 1)
        m_new = jnp.maximum(m_prev, jnp.max(s, axis=-1, keepdims=True))
        alpha = jnp.exp(m_prev - m_new)
        p = jnp.exp(s - m_new)                                          # (H, blk, blk) f32
        l_buf[...] = alpha * l_buf[...] + jnp.sum(p, axis=-1, keepdims=True)
        pv = lax.dot_general(p.astype(compute_dtype), v,
                             dimension_numbers=(((2,), (1,)), ((0,), (0,))),
                             preferred_element_type=f32)                # (H, blk, hd)
        acc_buf[...] = alpha * acc_buf[...] + pv
        m_buf[...] = m_new

    # ------------- strictly-lower blocks: unmasked fast path -------------
    @pl.when(ki < qi)
    def _off_diag():
        _update(masked=False)

    # ------------- diagonal block: masked update + finalize -------------
    @pl.when(ki == qi)
    def _diag_and_finalize():
        _update(masked=True)
        inv_l = pl.reciprocal(l_buf[...], approx=approx)                # EUP reciprocal
        o_ref[0] = (acc_buf[...] * inv_l).astype(o_ref.dtype)


def _round_up(a, m):
    return ((a + m - 1) // m) * m


def multi_head_attention(x, wq, wk, wv, wo, bo, *, num_heads,
                         compute_dtype=jnp.bfloat16, block_size=256):
    """x: (B, T, d_in); wq/wk/wv: (d_in, d_out); wo: (d_out, d_out); bo: (d_out,)."""
    B, T, d_in = x.shape
    d_out = wq.shape[1]
    assert d_out % num_heads == 0, "d_out must be divisible by num_heads"
    assert block_size % 8 == 0, "block_size must be a multiple of 8 sublanes"
    head_dim = d_out // num_heads
    out_dtype = x.dtype
    f32 = jnp.float32

    # ---- Hoisted Q/K/V projections: once per token (review's top optimization). ----
    xc = x.astype(compute_dtype)

    def _proj(w):
        return jnp.einsum("btd,de->bte", xc, w.astype(compute_dtype),
                          preferred_element_type=f32)

    scale = 1.0 / math.sqrt(head_dim)
    q = _proj(wq) * scale                                                # fold scale into q once
    k = _proj(wk)
    v = _proj(wv)

    def _to_heads(a):
        return (a.reshape(B, T, num_heads, head_dim)
                 .transpose(0, 2, 1, 3)                                  # (B, H, T, head_dim)
                 .astype(compute_dtype))

    q, k, v = _to_heads(q), _to_heads(k), _to_heads(v)

    # ---- Pad T to a multiple of the block (causal mask already excludes padded key
    #      columns for real rows; padded query rows are sliced off at the end). ----
    blk = min(block_size, _round_up(T, 8))
    t_pad = _round_up(T, blk)
    if t_pad != T:
        pad = ((0, 0), (0, 0), (0, t_pad - T), (0, 0))
        q, k, v = (jnp.pad(a, pad) for a in (q, k, v))
    num_blocks = t_pad // blk

    # ---- Triangular (qi, ki) schedule: only lower-triangular blocks are visited. ----
    qi_list, ki_list = [], []
    for qb in range(num_blocks):
        for kb in range(qb + 1):
            qi_list.append(qb)
            ki_list.append(kb)
    qi_map = jnp.asarray(qi_list, dtype=jnp.int32)
    ki_map = jnp.asarray(ki_list, dtype=jnp.int32)
    num_steps = len(qi_list)

    # ---- Generation-aware VMEM budget (64 MiB on v7x, 128 MiB on v5e/v6e). ----
    try:
        vmem_cap = pltpu.get_tpu_info().vmem_capacity_bytes
    except Exception:
        vmem_cap = 64 * 1024 * 1024
    vmem_limit = int(min(100 * 1024 * 1024, (vmem_cap * 3) // 4))

    H = num_heads
    kernel = functools.partial(_flash_attn_kernel, block=blk, compute_dtype=compute_dtype)

    ctx = pl.pallas_call(
        kernel,
        out_shape=jax.ShapeDtypeStruct((B, H, t_pad, head_dim), compute_dtype),
        grid_spec=pltpu.PrefetchScalarGridSpec(
            num_scalar_prefetch=2,
            grid=(B, num_steps),
            in_specs=[
                pl.BlockSpec((1, H, blk, head_dim), lambda b, s, qm, km: (b, 0, qm[s], 0)),
                pl.BlockSpec((1, H, blk, head_dim), lambda b, s, qm, km: (b, 0, km[s], 0)),
                pl.BlockSpec((1, H, blk, head_dim), lambda b, s, qm, km: (b, 0, km[s], 0)),
            ],
            out_specs=pl.BlockSpec((1, H, blk, head_dim),
                                   lambda b, s, qm, km: (b, 0, qm[s], 0)),
            scratch_shapes=[
                pltpu.VMEM((H, blk, 1), f32),          # running max
                pltpu.VMEM((H, blk, 1), f32),          # running sum
                pltpu.VMEM((H, blk, head_dim), f32),   # output accumulator
            ],
        ),
        compiler_params=pltpu.CompilerParams(
            dimension_semantics=("parallel", "arbitrary"),
            vmem_limit_bytes=vmem_limit,
        ),
    )(qi_map, ki_map, q, k, v)

    # ---- Unpad, merge heads, output projection (single lane-dense matmul; keeping Wo out
    #      of the kernel also removes the double-buffered constant-weight VMEM cost). ----
    ctx = ctx[:, :, :T, :].transpose(0, 2, 1, 3).reshape(B, T, d_out)
    out = jnp.einsum("btd,de->bte", ctx.astype(compute_dtype), wo.astype(compute_dtype),
                     preferred_element_type=f32) + bo.astype(f32)
    return out.astype(out_dtype)


def _reference(x, wq, wk, wv, wo, bo, *, num_heads):
    B, T, d_in = x.shape
    d_out = wq.shape[1]
    head_dim = d_out // num_heads
    q = (x @ wq).reshape(B, T, num_heads, head_dim).transpose(0, 2, 1, 3)
    k = (x @ wk).reshape(B, T, num_heads, head_dim).transpose(0, 2, 1, 3)
    v = (x @ wv).reshape(B, T, num_heads, head_dim).transpose(0, 2, 1, 3)
    s = jnp.einsum("bhtd,bhsd->bhts", q, k) / math.sqrt(head_dim)
    mask = jnp.tril(jnp.ones((T, T), bool))
    s = jnp.where(mask[None, None], s, -jnp.inf)
    w = jax.nn.softmax(s, axis=-1)
    ctx = jnp.einsum("bhts,bhsd->bhtd", w, v).transpose(0, 2, 1, 3).reshape(B, T, d_out)
    return ctx @ wo + bo


if __name__ == "__main__":
    # Small, module-consistent shapes.
    B, T, d_in, d_out, num_heads = 2, 8, 32, 32, 4

    key = jax.random.PRNGKey(0)
    kx, kq, kk, kv, ko, kb, kx2, kx3 = jax.random.split(key, 8)

    x = jax.random.normal(kx, (B, T, d_in), dtype=jnp.float32)
    # Deterministic synthetic parameters (stored in x@W convention, i.e. W_pt.T).
    wq = jax.random.normal(kq, (d_in, d_out), dtype=jnp.float32) * (1.0 / math.sqrt(d_in))
    wk = jax.random.normal(kk, (d_in, d_out), dtype=jnp.float32) * (1.0 / math.sqrt(d_in))
    wv = jax.random.normal(kv, (d_in, d_out), dtype=jnp.float32) * (1.0 / math.sqrt(d_in))
    wo = jax.random.normal(ko, (d_out, d_out), dtype=jnp.float32) * (1.0 / math.sqrt(d_out))
    bo = jax.random.normal(kb, (d_out,), dtype=jnp.float32) * 0.01

    # 1) f32 compute path, single block (T == blk) — tight tolerance vs the reference.
    out = multi_head_attention(x, wq, wk, wv, wo, bo, num_heads=num_heads,
                               compute_dtype=jnp.float32)
    out = jax.block_until_ready(out)
    ref = _reference(x, wq, wk, wv, wo, bo, num_heads=num_heads)
    assert out.shape == (B, T, d_out)
    assert jnp.allclose(out, ref, atol=1e-4, rtol=1e-4), "f32 single-block mismatch"

    # 2) f32 compute path, multi-block: exercises the triangular schedule, online softmax,
    #    diagonal-only masking and the accumulator init/finalize logic.
    T2 = 32
    x2 = jax.random.normal(kx2, (B, T2, d_in), dtype=jnp.float32)
    out2 = multi_head_attention(x2, wq, wk, wv, wo, bo, num_heads=num_heads,
                                compute_dtype=jnp.float32, block_size=8)
    out2 = jax.block_until_ready(out2)
    ref2 = _reference(x2, wq, wk, wv, wo, bo, num_heads=num_heads)
    assert jnp.allclose(out2, ref2, atol=1e-4, rtol=1e-4), "f32 multi-block mismatch"

    # 3) f32 compute path, ragged T (not a multiple of the block): exercises the padding path.
    T3 = 20
    x3 = jax.random.normal(kx3, (B, T3, d_in), dtype=jnp.float32)
    out3 = multi_head_attention(x3, wq, wk, wv, wo, bo, num_heads=num_heads,
                                compute_dtype=jnp.float32, block_size=8)
    out3 = jax.block_until_ready(out3)
    ref3 = _reference(x3, wq, wk, wv, wo, bo, num_heads=num_heads)
    assert jnp.allclose(out3, ref3, atol=1e-4, rtol=1e-4), "f32 ragged-T mismatch"

    # 4) bf16 MXU-operand path (f32 accumulation / f32 softmax stats) — relaxed tolerance.
    out4 = multi_head_attention(x2, wq, wk, wv, wo, bo, num_heads=num_heads,
                                compute_dtype=jnp.bfloat16, block_size=8)
    out4 = jax.block_until_ready(out4)
    assert jnp.allclose(out4.astype(jnp.float32), ref2, atol=5e-2, rtol=5e-2), \
        "bf16 path mismatch"

    print("KERNEL_OK")
</pallas_src>

<mosaic_0001>
module attributes {stable_mosaic.version = 11 : i64} {
  func.func @_flash_attn_kernel(%arg0: i32, %arg1: i32, %arg2: memref<1xi32, #tpu.memory_space<smem>>, %arg3: memref<1xi32, #tpu.memory_space<smem>>, %arg4: memref<1x4x8x8xf32, #tpu.memory_space<vmem>>, %arg5: memref<1x4x8x8xf32, #tpu.memory_space<vmem>>, %arg6: memref<1x4x8x8xf32, #tpu.memory_space<vmem>>, %arg7: memref<1x4x8x8xf32, #tpu.memory_space<vmem>>, %arg8: memref<4x8x1xf32, #tpu.memory_space<vmem>>, %arg9: memref<4x8x1xf32, #tpu.memory_space<vmem>>, %arg10: memref<4x8x8xf32, #tpu.memory_space<vmem>>) attributes {dimension_semantics = [#tpu.dimension_semantics<parallel>, #tpu.dimension_semantics<arbitrary>], iteration_bounds = array<i64: 2, 1>, scalar_prefetch = 2 : i64, scratch_operands = 3 : i64, tpu.core_type = #tpu.core_type<tc>, window_params = [{transform_indices = @transform_0, window_bounds = array<i64: 1, 4, 8, 8>}, {transform_indices = @transform_1, window_bounds = array<i64: 1, 4, 8, 8>}, {transform_indices = @transform_2, window_bounds = array<i64: 1, 4, 8, 8>}, {transform_indices = @transform_3, window_bounds = array<i64: 1, 4, 8, 8>}]} {
    %0 = arith.index_cast %arg1 : i32 to index
    %1 = memref.load %arg2[%0] : memref<1xi32, #tpu.memory_space<smem>>
    %2 = arith.index_cast %arg1 : i32 to index
    %3 = memref.load %arg3[%2] : memref<1xi32, #tpu.memory_space<smem>>
    %c0_i32 = arith.constant 0 : i32
    %4 = arith.cmpi eq, %3, %c0_i32 : i32
    %5 = arith.extui %4 : i1 to i32
    %c0_i32_0 = arith.constant 0 : i32
    %6 = arith.cmpi ne, %5, %c0_i32_0 : i32
    scf.if %6 {
      %cst = arith.constant 0xFF800000 : f32
      %13 = vector.broadcast %cst : f32 to vector<4x8x1xf32>
      %c0 = arith.constant 0 : index
      %c0_3 = arith.constant 0 : index
      %c0_4 = arith.constant 0 : index
      %14 = vector.load %arg8[%c0, %c0_3, %c0_4] : memref<4x8x1xf32, #tpu.memory_space<vmem>>, vector<4x8x1xf32>
      tpu.vector_store %arg8[%c0, %c0_3, %c0_4], %13 {strides = array<i32>} : memref<4x8x1xf32, #tpu.memory_space<vmem>>, vector<4x8x1xf32>,
      %cst_5 = arith.constant 0.000000e+00 : f32
      %15 = vector.broadcast %cst_5 : f32 to vector<4x8x1xf32>
      %c0_6 = arith.constant 0 : index
      %c0_7 = arith.constant 0 : index
      %c0_8 = arith.constant 0 : index
      %16 = vector.load %arg9[%c0_6, %c0_7, %c0_8] : memref<4x8x1xf32, #tpu.memory_space<vmem>>, vector<4x8x1xf32>
      tpu.vector_store %arg9[%c0_6, %c0_7, %c0_8], %15 {strides = array<i32>} : memref<4x8x1xf32, #tpu.memory_space<vmem>>, vector<4x8x1xf32>,
      %cst_9 = arith.constant 0.000000e+00 : f32
      %17 = vector.broadcast %cst_9 : f32 to vector<4x8x8xf32>
      %c0_10 = arith.constant 0 : index
      %c0_11 = arith.constant 0 : index
      %c0_12 = arith.constant 0 : index
      %18 = vector.load %arg10[%c0_10, %c0_11, %c0_12] : memref<4x8x8xf32, #tpu.memory_space<vmem>>, vector<4x8x8xf32>
      tpu.vector_store %arg10[%c0_10, %c0_11, %c0_12], %17 {strides = array<i32>} : memref<4x8x8xf32, #tpu.memory_space<vmem>>, vector<4x8x8xf32>,
    } else {
    }
    %7 = arith.cmpi slt, %3, %1 : i32
    %8 = arith.extui %7 : i1 to i32
    %c0_i32_1 = arith.constant 0 : i32
    %9 = arith.cmpi ne, %8, %c0_i32_1 : i32
    scf.if %9 {
      %c0 = arith.constant 0 : index
      %c0_3 = arith.constant 0 : index
      %c0_4 = arith.constant 0 : index
      %c0_5 = arith.constant 0 : index
      %13 = vector.load %arg4[%c0, %c0_3, %c0_4, %c0_5] : memref<1x4x8x8xf32, #tpu.memory_space<vmem>>, vector<1x4x8x8xf32>
      %14 = vector.shape_cast %13 : vector<1x4x8x8xf32> to vector<4x8x8xf32>
      %c0_6 = arith.constant 0 : index
      %c0_7 = arith.constant 0 : index
      %c0_8 = arith.constant 0 : index
      %c0_9 = arith.constant 0 : index
      %15 = vector.load %arg5[%c0_6, %c0_7, %c0_8, %c0_9] : memref<1x4x8x8xf32, #tpu.memory_space<vmem>>, vector<1x4x8x8xf32>
      %16 = vector.shape_cast %15 : vector<1x4x8x8xf32> to vector<4x8x8xf32>
      %c0_10 = arith.constant 0 : index
      %c0_11 = arith.constant 0 : index
      %c0_12 = arith.constant 0 : index
      %c0_13 = arith.constant 0 : index
      %17 = vector.load %arg6[%c0_10, %c0_11, %c0_12, %c0_13] : memref<1x4x8x8xf32, #tpu.memory_space<vmem>>, vector<1x4x8x8xf32>
      %18 = vector.shape_cast %17 : vector<1x4x8x8xf32> to vector<4x8x8xf32>
      %cst = arith.constant dense<0.000000e+00> : vector<4x8x8xf32>
      %19 = tpu.matmul %14, %16, %cst {dimension_numbers = #tpu.dot_dimension_numbers<[2], [2], [1], [1], [0, 0, 0, 1, 1, 1], [0], [0]>} : vector<4x8x8xf32>, vector<4x8x8xf32>, vector<4x8x8xf32> -> vector<4x8x8xf32>
      %c0_14 = arith.constant 0 : index
      %c0_15 = arith.constant 0 : index
      %c0_16 = arith.constant 0 : index
      %20 = vector.load %arg8[%c0_14, %c0_15, %c0_16] : memref<4x8x1xf32, #tpu.memory_space<vmem>>, vector<4x8x1xf32>
      %cst_17 = arith.constant dense<0xFF800000> : vector<4x8xf32>
      %21 = vector.multi_reduction <maximumf>, %19, %cst_17 [2] : vector<4x8x8xf32> to vector<4x8xf32>
      %22 = vector.shape_cast %21 : vector<4x8xf32> to vector<4x8x1xf32>
      %23 = arith.maximumf %20, %22 : vector<4x8x1xf32>
      %24 = arith.subf %20, %23 : vector<4x8x1xf32>
      %25 = math.exp %24 : vector<4x8x1xf32>
      %26 = vector.broadcast %23 : vector<4x8x1xf32> to vector<4x8x8xf32>
      %27 = arith.subf %19, %26 : vector<4x8x8xf32>
      %28 = math.exp %27 : vector<4x8x8xf32>
      %c0_18 = arith.constant 0 : index
      %c0_19 = arith.constant 0 : index
      %c0_20 = arith.constant 0 : index
      %29 = vector.load %arg9[%c0_18, %c0_19, %c0_20] : memref<4x8x1xf32, #tpu.memory_space<vmem>>, vector<4x8x1xf32>
      %30 = arith.mulf %25, %29 : vector<4x8x1xf32>
      %cst_21 = arith.constant dense<0.000000e+00> : vector<4x8xf32>
      %31 = vector.multi_reduction <add>, %28, %cst_21 [2] : vector<4x8x8xf32> to vector<4x8xf32>
      %32 = vector.shape_cast %31 : vector<4x8xf32> to vector<4x8x1xf32>
      %33 = arith.addf %30, %32 : vector<4x8x1xf32>
      %c0_22 = arith.constant 0 : index
      %c0_23 = arith.constant 0 : index
      %c0_24 = arith.constant 0 : index
      %34 = vector.load %arg9[%c0_22, %c0_23, %c0_24] : memref<4x8x1xf32, #tpu.memory_space<vmem>>, vector<4x8x1xf32>
      tpu.vector_store %arg9[%c0_22, %c0_23, %c0_24], %33 {strides = array<i32>} : memref<4x8x1xf32, #tpu.memory_space<vmem>>, vector<4x8x1xf32>,
      %cst_25 = arith.constant dense<0.000000e+00> : vector<4x8x8xf32>
      %35 = tpu.matmul %28, %18, %cst_25 {dimension_numbers = #tpu.dot_dimension_numbers<[2], [1], [1], [2], [0, 0, 0, 1, 1, 2], [0], [0]>} : vector<4x8x8xf32>, vector<4x8x8xf32>, vector<4x8x8xf32> -> vector<4x8x8xf32>
      %c0_26 = arith.constant 0 : index
      %c0_27 = arith.constant 0 : index
      %c0_28 = arith.constant 0 : index
      %36 = vector.load %arg10[%c0_26, %c0_27, %c0_28] : memref<4x8x8xf32, #tpu.memory_space<vmem>>, vector<4x8x8xf32>
      %37 = vector.broadcast %25 : vector<4x8x1xf32> to vector<4x8x8xf32>
      %38 = arith.mulf %37, %36 : vector<4x8x8xf32>
      %39 = arith.addf %38, %35 : vector<4x8x8xf32>
      %c0_29 = arith.constant 0 : index
      %c0_30 = arith.constant 0 : index
      %c0_31 = arith.constant 0 : index
      %40 = vector.load %arg10[%c0_29, %c0_30, %c0_31] : memref<4x8x8xf32, #tpu.memory_space<vmem>>, vector<4x8x8xf32>
      tpu.vector_store %arg10[%c0_29, %c0_30, %c0_31], %39 {strides = array<i32>} : memref<4x8x8xf32, #tpu.memory_space<vmem>>, vector<4x8x8xf32>,
      %c0_32 = arith.constant 0 : index
      %c0_33 = arith.constant 0 : index
      %c0_34 = arith.constant 0 : index
      %41 = vector.load %arg8[%c0_32, %c0_33, %c0_34] : memref<4x8x1xf32, #tpu.memory_space<vmem>>, vector<4x8x1xf32>
      tpu.vector_store %arg8[%c0_32, %c0_33, %c0_34], %23 {strides = array<i32>} : memref<4x8x1xf32, #tpu.memory_space<vmem>>, vector<4x8x1xf32>,
    } else {
    }
    %10 = arith.cmpi eq, %3, %1 : i32
    %11 = arith.extui %10 : i1 to i32
    %c0_i32_2 = arith.constant 0 : i32
    %12 = arith.cmpi ne, %11, %c0_i32_2 : i32
    scf.if %12 {
      %c0 = arith.constant 0 : index
      %c0_3 = arith.constant 0 : index
      %c0_4 = arith.constant 0 : index
      %c0_5 = arith.constant 0 : index
      %13 = vector.load %arg4[%c0, %c0_3, %c0_4, %c0_5] : memref<1x4x8x8xf32, #tpu.memory_space<vmem>>, vector<1x4x8x8xf32>
      %14 = vector.shape_cast %13 : vector<1x4x8x8xf32> to vector<4x8x8xf32>
      %c0_6 = arith.constant 0 : index
      %c0_7 = arith.constant 0 : index
      %c0_8 = arith.constant 0 : index
      %c0_9 = arith.constant 0 : index
      %15 = vector.load %arg5[%c0_6, %c0_7, %c0_8, %c0_9] : memref<1x4x8x8xf32, #tpu.memory_space<vmem>>, vector<1x4x8x8xf32>
      %16 = vector.shape_cast %15 : vector<1x4x8x8xf32> to vector<4x8x8xf32>
      %c0_10 = arith.constant 0 : index
      %c0_11 = arith.constant 0 : index
      %c0_12 = arith.constant 0 : index
      %c0_13 = arith.constant 0 : index
      %17 = vector.load %arg6[%c0_10, %c0_11, %c0_12, %c0_13] : memref<1x4x8x8xf32, #tpu.memory_space<vmem>>, vector<1x4x8x8xf32>
      %18 = vector.shape_cast %17 : vector<1x4x8x8xf32> to vector<4x8x8xf32>
      %cst = arith.constant dense<0.000000e+00> : vector<4x8x8xf32>
      %19 = tpu.matmul %14, %16, %cst {dimension_numbers = #tpu.dot_dimension_numbers<[2], [2], [1], [1], [0, 0, 0, 1, 1, 1], [0], [0]>} : vector<4x8x8xf32>, vector<4x8x8xf32>, vector<4x8x8xf32> -> vector<4x8x8xf32>
      %20 = tpu.iota {dimensions = array<i32: 0>} : vector<8x8xi32>
      %21 = tpu.iota {dimensions = array<i32: 1>} : vector<8x8xi32>
      %22 = arith.cmpi sle, %21, %20 : vector<8x8xi32>
      %23 = vector.shape_cast %22 : vector<8x8xi1> to vector<1x8x8xi1>
      %cst_14 = arith.constant 0xFF800000 : f32
      %24 = vector.shape_cast %23 : vector<1x8x8xi1> to vector<1x8x8xi1>
      %25 = vector.broadcast %24 : vector<1x8x8xi1> to vector<4x8x8xi1>
      %26 = vector.broadcast %cst_14 : f32 to vector<4x8x8xf32>
      %27 = arith.select %25, %19, %26 : vector<4x8x8xi1>, vector<4x8x8xf32>
      %c0_15 = arith.constant 0 : index
      %c0_16 = arith.constant 0 : index
      %c0_17 = arith.constant 0 : index
      %28 = vector.load %arg8[%c0_15, %c0_16, %c0_17] : memref<4x8x1xf32, #tpu.memory_space<vmem>>, vector<4x8x1xf32>
      %cst_18 = arith.constant dense<0xFF800000> : vector<4x8xf32>
      %29 = vector.multi_reduction <maximumf>, %27, %cst_18 [2] : vector<4x8x8xf32> to vector<4x8xf32>
      %30 = vector.shape_cast %29 : vector<4x8xf32> to vector<4x8x1xf32>
      %31 = arith.maximumf %28, %30 : vector<4x8x1xf32>
      %32 = arith.subf %28, %31 : vector<4x8x1xf32>
      %33 = math.exp %32 : vector<4x8x1xf32>
      %34 = vector.broadcast %31 : vector<4x8x1xf32> to vector<4x8x8xf32>
      %35 = arith.subf %27, %34 : vector<4x8x8xf32>
      %36 = math.exp %35 : vector<4x8x8xf32>
      %c0_19 = arith.constant 0 : index
      %c0_20 = arith.constant 0 : index
      %c0_21 = arith.constant 0 : index
      %37 = vector.load %arg9[%c0_19, %c0_20, %c0_21] : memref<4x8x1xf32, #tpu.memory_space<vmem>>, vector<4x8x1xf32>
      %38 = arith.mulf %33, %37 : vector<4x8x1xf32>
      %cst_22 = arith.constant dense<0.000000e+00> : vector<4x8xf32>
      %39 = vector.multi_reduction <add>, %36, %cst_22 [2] : vector<4x8x8xf32> to vector<4x8xf32>
      %40 = vector.shape_cast %39 : vector<4x8xf32> to vector<4x8x1xf32>
      %41 = arith.addf %38, %40 : vector<4x8x1xf32>
      %c0_23 = arith.constant 0 : index
      %c0_24 = arith.constant 0 : index
      %c0_25 = arith.constant 0 : index
      %42 = vector.load %arg9[%c0_23, %c0_24, %c0_25] : memref<4x8x1xf32, #tpu.memory_space<vmem>>, vector<4x8x1xf32>
      tpu.vector_store %arg9[%c0_23, %c0_24, %c0_25], %41 {strides = array<i32>} : memref<4x8x1xf32, #tpu.memory_space<vmem>>, vector<4x8x1xf32>,
      %cst_26 = arith.constant dense<0.000000e+00> : vector<4x8x8xf32>
      %43 = tpu.matmul %36, %18, %cst_26 {dimension_numbers = #tpu.dot_dimension_numbers<[2], [1], [1], [2], [0, 0, 0, 1, 1, 2], [0], [0]>} : vector<4x8x8xf32>, vector<4x8x8xf32>, vector<4x8x8xf32> -> vector<4x8x8xf32>
      %c0_27 = arith.constant 0 : index
      %c0_28 = arith.constant 0 : index
      %c0_29 = arith.constant 0 : index
      %44 = vector.load %arg10[%c0_27, %c0_28, %c0_29] : memref<4x8x8xf32, #tpu.memory_space<vmem>>, vector<4x8x8xf32>
      %45 = vector.broadcast %33 : vector<4x8x1xf32> to vector<4x8x8xf32>
      %46 = arith.mulf %45, %44 : vector<4x8x8xf32>
      %47 = arith.addf %46, %43 : vector<4x8x8xf32>
      %c0_30 = arith.constant 0 : index
      %c0_31 = arith.constant 0 : index
      %c0_32 = arith.constant 0 : index
      %48 = vector.load %arg10[%c0_30, %c0_31, %c0_32] : memref<4x8x8xf32, #tpu.memory_space<vmem>>, vector<4x8x8xf32>
      tpu.vector_store %arg10[%c0_30, %c0_31, %c0_32], %47 {strides = array<i32>} : memref<4x8x8xf32, #tpu.memory_space<vmem>>, vector<4x8x8xf32>,
      %c0_33 = arith.constant 0 : index
      %c0_34 = arith.constant 0 : index
      %c0_35 = arith.constant 0 : index
      %49 = vector.load %arg8[%c0_33, %c0_34, %c0_35] : memref<4x8x1xf32, #tpu.memory_space<vmem>>, vector<4x8x1xf32>
      tpu.vector_store %arg8[%c0_33, %c0_34, %c0_35], %31 {strides = array<i32>} : memref<4x8x1xf32, #tpu.memory_space<vmem>>, vector<4x8x1xf32>,
      %c0_36 = arith.constant 0 : index
      %c0_37 = arith.constant 0 : index
      %c0_38 = arith.constant 0 : index
      %50 = vector.load %arg9[%c0_36, %c0_37, %c0_38] : memref<4x8x1xf32, #tpu.memory_space<vmem>>, vector<4x8x1xf32>
      %51 = tpu.reciprocal %50 : vector<4x8x1xf32> -> vector<4x8x1xf32>
      %c0_39 = arith.constant 0 : index
      %c0_40 = arith.constant 0 : index
      %c0_41 = arith.constant 0 : index
      %52 = vector.load %arg10[%c0_39, %c0_40, %c0_41] : memref<4x8x8xf32, #tpu.memory_space<vmem>>, vector<4x8x8xf32>
      %53 = vector.broadcast %51 : vector<4x8x1xf32> to vector<4x8x8xf32>
      %54 = arith.mulf %52, %53 : vector<4x8x8xf32>
      %c0_42 = arith.constant 0 : index
      %c0_43 = arith.constant 0 : index
      %c0_44 = arith.constant 0 : index
      %c0_45 = arith.constant 0 : index
      %55 = vector.load %arg7[%c0_42, %c0_43, %c0_44, %c0_45] : memref<1x4x8x8xf32, #tpu.memory_space<vmem>>, vector<1x4x8x8xf32>
      %56 = vector.shape_cast %55 : vector<1x4x8x8xf32> to vector<4x8x8xf32>
      %57 = vector.shape_cast %54 : vector<4x8x8xf32> to vector<1x4x8x8xf32>
      tpu.vector_store %arg7[%c0_42, %c0_43, %c0_44, %c0_45], %57 {strides = array<i32>} : memref<1x4x8x8xf32, #tpu.memory_space<vmem>>, vector<1x4x8x8xf32>,
    } else {
    }
    return
  }
  func.func @transform_0(%arg0: i32, %arg1: i32, %arg2: memref<1xi32, #tpu.memory_space<smem>>, %arg3: memref<1xi32, #tpu.memory_space<smem>>) -> (i32, i32, i32, i32) {
    %0 = arith.index_cast %arg1 : i32 to index
    %1 = memref.load %arg2[%0] : memref<1xi32, #tpu.memory_space<smem>>
    %c0_i32 = arith.constant 0 : i32
    %c0_i32_0 = arith.constant 0 : i32
    %c0_i32_1 = arith.constant 0 : i32
    return %arg0, %c0_i32, %1, %c0_i32_0 : i32, i32, i32, i32
  }
  func.func @transform_1(%arg0: i32, %arg1: i32, %arg2: memref<1xi32, #tpu.memory_space<smem>>, %arg3: memref<1xi32, #tpu.memory_space<smem>>) -> (i32, i32, i32, i32) {
    %0 = arith.index_cast %arg1 : i32 to index
    %1 = memref.load %arg3[%0] : memref<1xi32, #tpu.memory_space<smem>>
    %c0_i32 = arith.constant 0 : i32
    %c0_i32_0 = arith.constant 0 : i32
    %c0_i32_1 = arith.constant 0 : i32
    return %arg0, %c0_i32, %1, %c0_i32_0 : i32, i32, i32, i32
  }
  func.func @transform_2(%arg0: i32, %arg1: i32, %arg2: memref<1xi32, #tpu.memory_space<smem>>, %arg3: memref<1xi32, #tpu.memory_space<smem>>) -> (i32, i32, i32, i32) {
    %0 = arith.index_cast %arg1 : i32 to index
    %1 = memref.load %arg3[%0] : memref<1xi32, #tpu.memory_space<smem>>
    %c0_i32 = arith.constant 0 : i32
    %c0_i32_0 = arith.constant 0 : i32
    %c0_i32_1 = arith.constant 0 : i32
    return %arg0, %c0_i32, %1, %c0_i32_0 : i32, i32, i32, i32
  }
  func.func @transform_3(%arg0: i32, %arg1: i32, %arg2: memref<1xi32, #tpu.memory_space<smem>>, %arg3: memref<1xi32, #tpu.memory_space<smem>>) -> (i32, i32, i32, i32) {
    %0 = arith.index_cast %arg1 : i32 to index
    %1 = memref.load %arg2[%0] : memref<1xi32, #tpu.memory_space<smem>>
    %c0_i32 = arith.constant 0 : i32
    %c0_i32_0 = arith.constant 0 : i32
    %c0_i32_1 = arith.constant 0 : i32
    return %arg0, %c0_i32, %1, %c0_i32_0 : i32, i32, i32, i32
  }
}

</mosaic_0001>

<bundles_post_ra>
// kernel: tpu_custom_call.1
= control target key start
LH: loop header
LB: loop body
LE: loop exit
PB: predicated region body
PF: predicated region fallthrough
CT: control target
= control target key end

     0   :  { %s3311_s0 = inlined_call_operand.<no memory space> [shape: s32[1], index: 0, kind: input, shape index: {}]   ;;  %s3312_s1 = inlined_call_operand.<no memory space> [shape: s32[1], index: 1, kind: input, shape index: {}]   ;;  %s3313_s2 = inlined_call_operand.hbm [shape: f32[2,4,8,8], index: 2, kind: input, shape index: {}]   ;;  %s3314_s3 = inlined_call_operand.hbm [shape: f32[2,4,8,8], index: 3, kind: input, shape index: {}]   ;;  %s3315_s4 = inlined_call_operand.hbm [shape: f32[2,4,8,8], index: 4, kind: input, shape index: {}]   ;;  %s3316_s5 = inlined_call_operand.hbm [shape: f32[2,4,8,8], index: 5, kind: output, shape index: {}]  }
   0x1   :  { %3337 = sst [smem:[#allocation28_spill]] %s3313_s2 }
   0x2   :  { %3338 = sst [smem:[#allocation29_spill]] %s3314_s3 }
   0x3   :  { %3339 = sst [smem:[#allocation30_spill]] %s3316_s5 }
   0x4   :  { %10 = sst [smem:[#allocation6]] %s3311_s0 }
   0x5   :  { %11 = sst [smem:[#allocation7]] %s3312_s1 }
   0x6   :  { %12 = vsyncpa [#allocation9], 0 }
   0x7   :  { %14 = vsyncpa [#allocation9 + $0x1], 0 }
   0x8   :  { %15 = vsyncpa [#allocation12], 0 }
   0x9   :  { %17 = vsyncpa [#allocation12 + $0x1], 0 }
   0xa   :  { %18 = vsyncpa [#allocation10], 0 }
   0xb   :  { %20 = vsyncpa [#allocation10 + $0x1], 0  ;;  %s2687_s22 = smov 0   ;;  %s2689_s23 = smov 0  }
   0xc   :  { %s2691_s24 = smov 0   ;;  %s2693_s25 = smov 0  }
   0xd   :  { %s2695_s26 = smov 0   ;;  %s2697_s0 = smov 0  }
   0xe   :  { %s2699_s27 = smov 0   ;;  %s2701_s1 = smov 0  }
   0xf   :  { %s2703_s28 = smov 0   ;;  %s2705_s29 = smov 0  }
  0x10   :  { %s2707_s30 = smov 0   ;;  %s2709_s6 = smov 0  }
  0x11   :  { %s2711_s7 = smov 0   ;;  %s2713_s8 = smov 0  }
  0x12   :  { %s2715_s9 = smov 0  }
  0x13 LB: > { %3340 = sst [smem:[#allocation19_spill]] %s2577_s22  ;;  %s2761_s10 = sadd.s32 4294967295, %s2633_s9   ;;  %s2633_s9 = sphi %s2715_s9, %s26_s9   ;;  %s2629_s8 = sphi %s2713_s8, %s3392_s8   ;;  %s2625_s7 = sphi %s2711_s7, %s3391_s7   ;;  %s2621_s6 = sphi %s2709_s6, %s3401_s6   ;;  %s2617_s30 = sphi %s2707_s30, %s3400_s30   ;;  %s2613_s29 = sphi %s2705_s29, %s3399_s29   ;;  %s2609_s28 = sphi %s2703_s28, %s3398_s28   ;;  %s2605_s1 = sphi %s2701_s1, %s3397_s1   ;;  %s2601_s27 = sphi %s2699_s27, %s3396_s27   ;;  %s2597_s0 = sphi %s2697_s0, %s3395_s0   ;;  %s2593_s26 = sphi %s2695_s26, %s3394_s26   ;;  %s2589_s25 = sphi %s2693_s25, %s3393_s25   ;;  %s2585_s24 = sphi %s2691_s24, %s3389_s24   ;;  %s2581_s23 = sphi %s2689_s23, %s3388_s23   ;;  %s2577_s22 = sphi %s2687_s22, %s3387_s22  }
  0x14   : > { %3341 = sst [smem:[#allocation20_spill]] %s2581_s23  ;;  %s2020_s11 = sadd.s32 4294967294, %s2633_s9  }
  0x15   : > { %3342 = sst [smem:[#allocation21_spill]] %s2585_s24  ;;  %s38_s12 = sadd.s32 1, %s2629_s8 }
  0x16   : > { %3343 = sst [smem:[#allocation22_spill]] %s2625_s7  ;;  %s2765_s13 = sld [smem:[#allocation6]] }
  0x17   : > { %3344 = sst [smem:[#allocation23_spill]] %s2629_s8  ;;  %p40_p0 = scmp.ge.s32.totalorder %s38_s12, 2 }
  0x18   : > { %p3328_p1 = scmp.eq.s32.totalorder %s2633_s9, 0  ;;  %p3325_p2 = scmp.eq.s32.totalorder %s2761_s10, 0 }
  0x19   : > { %s72_s14 = sld [smem:[#allocation7]]  ;;  %s3403_s12 = smov (%p40_p0, %s38_s12), 0 }
  0x1a   : > { %3345 = sst [smem:[#allocation24_spill]] %s3403_s12  ;;  %s79_s15 = sadd.s32 1, %s2609_s28 }
  0x1b   : > { %p86_p3 = scmp.ne.s32.totalorder %s2609_s28, %s2605_s1  ;;  %s44_s16 = ssub.s32 %s2629_s8, %s3403_s12 }
  0x1c   : > { %p92_p4 = scmp.ne.s32.totalorder %s2605_s1, %s2601_s27  ;;  %p2789_p7 = scmp.eq.s32.totalorder %s44_s16, 0 }
  0x1d   : > { %p2779_p5 = por %p86_p3, %p3328_p1  ;;  %s139_s20 = sadd.s32 1, %s2585_s24 }
  0x1e   : > { %p2785_p6 = por %p92_p4, %p3325_p2  ;;  %p149_p8 = scmp.ne.s32.totalorder %s2585_s24, %s2581_s23 }
  0x1f   : > { %s2799_s21 = scalar_select %p2789_p7, %s2585_s24, %s139_s20  }
  0x20   : > { %s3347_s18 = scalar_select %p2785_p6, 1, 0 }
  0x21   : > { %3349 = sst [smem:[#allocation25_spill]] %s2799_s21  ;;  %p150_p9 = scmp.eq.s32.totalorder %s2761_s10, 1 }
  0x22   : > { %s2804_s27 = scalar_select %p2789_p7, %s2609_s28, %s79_s15  }
  0x23   : > { %p155_p10 = scmp.ne.s32.totalorder %s2581_s23, %s2577_s22  ;;  %p156_p11 = scmp.eq.s32.totalorder %s2020_s11, 1 }
  0x24   : > { %3350 = sst [smem:[#allocation26_spill]] %s2804_s27  ;;  %p2810_p13 = por %p150_p9, %p149_p8 }
  0x25   : > { %p3327_p0 = scmp.lt.s32.totalorder %s2633_s9, 2  ;;  %p2815_p3 = por %p156_p11, %p155_p10 }
  0x26   : > { %s3351_s16 = scalar_select %p2810_p13, 1, 0 }
  0x27   : > { %s3353_s12 = scalar_select %p2815_p3, 1, 0 }
  0x28   : > { %3352 = sst [smem:[#allocation27_spill]] %s3351_s16  ;;  %s2024_s20 = sshll.u32 %s2629_s8, 2 }
  0x29   : > { %s199_s15 = sand.u32 1, %s2633_s9   ;;  %s201_s27 = sand.u32 1, %s2609_s28  }
  0x2a   : > { %s2026_s21 = sshll.u32 %s201_s27, 5  ;;  %s2824_s24 = sadd.s32 %s2024_s20, %s72_s14 }
  0x2b   : > { %s3326_s11 = sshll.u32 %s2824_s24, 7  ;;  %s203_s22 = scalar_lea.vmem [#allocation11], %s2026_s21 }
  0x2c   : > { %s212_s5 = sshll.u32 %s203_s22, 4  ;;  %s3354_s3 = sld [smem:[#allocation29_spill]]  ;;  %s2834_s5 = int_to_ptr.vmem [resolvable:$true] %s212_s5 }
  0x2d   : > { %p2840_p4 = pnand %p3327_p0, %p2779_p5  ;;  %s2846_s22 = scalar_lea.sflag [#allocation12], %s199_s15 }
  0x2f   : > { %p2383_p11 = pneg %p2840_p4 }
  0x32   : > { %s2832_s23 = scalar_lea.hbm %s3354_s3, %s3326_s11  ;;  %s2386_s27 = scalar_lea.hbm %s3354_s3, 1024 }
  0x33   : > { %s2381_s7 = scalar_lea.hbm %s2832_s23, 512  ;;  %p2387_p5 = scmp.lt.u32.totalorder %s2832_s23, %s3354_s3 }
  0x34   : > { %p2382_p10 = scmp.ne.s32.totalorder %s2832_s23, %s2381_s7  ;;  %p2388_p0 = scmp.lt.u32.totalorder %s2386_s27, %s2381_s7 }
  0x35   : > { %p2390_p8 = scmp.lt.u32.totalorder %s2381_s7, %s2832_s23 }
  0x36   : > { %p2384_p12 = pnand %p2383_p11, %p2382_p10  ;;  %p2389_p1 = por %p2388_p0, %p2387_p5 }
  0x38   : > { %p2385_p2 = pneg %p2384_p12  ;;  %p2391_p9 = por %p2390_p8, %p2389_p1 }
  0x3a   : > { %p2392_p3 = pnand %p2391_p9, %p2385_p2 }
  0x3c   : > { %2395 = shalt.err (!%p2392_p3)
}
  0x3d   : > { %s2396_s15 = scalar_lea.vmem %s2834_s5, 512  ;;  %s2635_s17 = smov [#allocation11]  }
  0x3e   : > { %p2397_p12 = scmp.ne.s32.totalorder %s2834_s5, %s2396_s15  ;;  %s2401_s21 = sshll.u32 %s2635_s17, 4  ;;  %s2402_s21 = int_to_ptr.vmem [resolvable:$false] %s2401_s21 }
  0x3f   : > { %s2403_s11 = scalar_lea.vmem %s2402_s21, 1024  ;;  %p2404_p6 = scmp.lt.s32.totalorder %s2834_s5, %s2402_s21 }
  0x40   : > { %p2399_p10 = pnand %p2397_p12, %p2383_p11  ;;  %p2405_p0 = scmp.lt.s32.totalorder %s2403_s11, %s2396_s15 }
  0x42   : > { %p2400_p13 = pneg %p2399_p10  ;;  %p2406_p5 = por %p2405_p0, %p2404_p6 }
  0x44   : > { %p2407_p1 = pnand %p2406_p5, %p2400_p13 }
  0x46   : > { %2410 = shalt.err (!%p2407_p1)
}
  0x47   : > { %s3331_s7 = smov 128   ;;  %s3333_s27 = smov 8  }
  0x48   : > { %2195 = dma.hbm_to_vmem [thread:$0]  (!%p2840_p4), %s2832_s23, 512, %s2834_s5, %s2846_s22, %s3331_s7, %s3331_s7, %s3333_s27  }
  0x49   : > { %p3356_p2 = scmp.lt.s32.totalorder %s2633_s9, 3  ;;  %p3357_p6 = scmp.ge.s32.totalorder %s2633_s9, 1 }
  0x4a   : > { %s49_s15 = sadd.s32 1, %s2621_s6  ;;  %p56_p3 = scmp.ne.s32.totalorder %s2621_s6, %s2617_s30 }
  0x4b   : > { %p2881_p13 = pnand %p3357_p6, %p3356_p2  ;;  %p62_p8 = scmp.ne.s32.totalorder %s2617_s30, %s2613_s29 }
  0x4c   : > { %s2889_s17 = scalar_select %p2789_p7, %s2621_s6, %s49_s15  }
  0x4d   : > { %s3358_s16 = scalar_select %p2881_p13, 1, 0 }
  0x4e   : > { %s176_s21 = sand.u32 1, %s2621_s6   ;;  %s186_s14 = sadd.s32 %s2024_s20, %s2765_s13 }
  0x4f   : > { %p3359_p9 = scmp.eq.s32.totalorder %s2633_s9, 0  ;;  %p3360_p12 = scmp.eq.s32.totalorder %s2761_s10, 0 }
  0x50   : > { %s2023_s23 = sshll.u32 %s176_s21, 5  ;;  %s2025_s11 = sshll.u32 %s186_s14, 7 }
  0x51   : > { %p58_p11 = por %p3359_p9, %p56_p3  ;;  %p2903_p4 = por %p3360_p12, %p62_p8 }
  0x52   : > { %s3362_s2 = sld [smem:[#allocation28_spill]]  ;;  %s180_s29 = scalar_lea.vmem [#allocation8], %s2023_s23 }
  0x53   : > { %s3361_s5 = scalar_select %p2903_p4, 1, 0 }
  0x54   : > { %s189_s13 = sshll.u32 %s180_s29, 4  ;;  %p3363_p10 = scmp.lt.s32.totalorder %s2633_s9, 2  ;;  %s2912_s13 = int_to_ptr.vmem [resolvable:$true] %s189_s13 }
  0x55   : > { %s2920_s15 = scalar_lea.sflag [#allocation9], %s176_s21 }
  0x56   : > { %p2916_p0 = pnand %p3363_p10, %p58_p11 }
  0x58   : > { %s2910_s3 = scalar_lea.hbm %s3362_s2, %s2025_s11  ;;  %p2413_p1 = pneg %p2916_p0 }
  0x59   : > { %s2411_s7 = scalar_lea.hbm %s2910_s3, 512  ;;  %s2416_s23 = scalar_lea.hbm %s3362_s2, 1024 }
  0x5a   : > { %p2412_p5 = scmp.ne.s32.totalorder %s2910_s3, %s2411_s7  ;;  %p2417_p3 = scmp.lt.u32.totalorder %s2910_s3, %s3362_s2 }
  0x5b   : > { %p2418_p8 = scmp.lt.u32.totalorder %s2416_s23, %s2411_s7  ;;  %p2420_p11 = scmp.lt.u32.totalorder %s2411_s7, %s2910_s3 }
  0x5c   : > { %p2414_p2 = pnand %p2413_p1, %p2412_p5 }
  0x5d   : > { %p2419_p9 = por %p2418_p8, %p2417_p3 }
  0x5e   : > { %p2415_p6 = pneg %p2414_p2 }
  0x5f   : > { %p2421_p12 = por %p2420_p11, %p2419_p9 }
  0x61   : > { %p2422_p10 = pnand %p2421_p12, %p2415_p6 }
  0x63   : > { %2425 = shalt.err (!%p2422_p10)
}
  0x64   : > { %s2426_s21 = scalar_lea.vmem %s2912_s13, 512  ;;  %s2638_s27 = smov [#allocation8]  }
  0x65   : > { %p2427_p5 = scmp.ne.s32.totalorder %s2912_s13, %s2426_s21  ;;  %s2431_s14 = sshll.u32 %s2638_s27, 4  ;;  %s2432_s14 = int_to_ptr.vmem [resolvable:$false] %s2431_s14 }
  0x66   : > { %s2433_s11 = scalar_lea.vmem %s2432_s14, 1024  ;;  %p2434_p13 = scmp.lt.s32.totalorder %s2912_s13, %s2432_s14 }
  0x67   : > { %p2429_p2 = pnand %p2427_p5, %p2413_p1  ;;  %p2435_p3 = scmp.lt.s32.totalorder %s2433_s11, %s2426_s21 }
  0x69   : > { %p2430_p4 = pneg %p2429_p2  ;;  %p2436_p8 = por %p2435_p3, %p2434_p13 }
  0x6b   : > { %p2437_p9 = pnand %p2436_p8, %p2430_p4 }
  0x6d   : > { %2440 = shalt.err (!%p2437_p9)
}
  0x6e   : > { %s3365_s7 = smov 8   ;;  %s3366_s23 = smov 128  }
  0x6f   : > { %2192 = dma.hbm_to_vmem [thread:$0]  (!%p2916_p0), %s2910_s3, 512, %s2912_s13, %s2920_s15, %s3366_s23, %s3366_s23, %s3365_s7  }
  0x70   : > { %s109_s20 = sadd.s32 1, %s2597_s0  ;;  %p116_p13 = scmp.ne.s32.totalorder %s2597_s0, %s2593_s26 }
  0x71   : > { %s2955_s29 = scalar_select %p2789_p7, %s2597_s0, %s109_s20  }
  0x72   : > { %p122_p4 = scmp.ne.s32.totalorder %s2593_s26, %s2589_s25  ;;  %s224_s21 = sand.u32 1, %s2597_s0  }
  0x73   : > { %p3367_p1 = scmp.eq.s32.totalorder %s2633_s9, 0  ;;  %p3368_p11 = scmp.eq.s32.totalorder %s2761_s10, 0 }
  0x74   : > { %s2029_s14 = sshll.u32 %s224_s21, 5  ;;  %s3370_s11 = sshll.u32 %s2824_s24, 7 }
  0x75   : > { %p118_p6 = por %p116_p13, %p3367_p1  ;;  %p2966_p12 = por %p122_p4, %p3368_p11 }
  0x76   : > { %s2975_s3 = scalar_lea.hbm %s3315_s4, %s3370_s11  ;;  %p3371_p0 = scmp.lt.s32.totalorder %s2633_s9, 2 }
  0x77   : > { %s226_s19 = scalar_lea.vmem [#allocation13], %s2029_s14  ;;  %s2441_s24 = scalar_lea.hbm %s2975_s3, 512 }
  0x78   : > { %p2979_p7 = pnand %p3371_p0, %p118_p6  ;;  %s235_s13 = sshll.u32 %s226_s19, 4  ;;  %s2983_s13 = int_to_ptr.vmem [resolvable:$true] %s235_s13 }
  0x79   : > { %p2442_p10 = scmp.ne.s32.totalorder %s2975_s3, %s2441_s24  ;;  %s2446_s15 = scalar_lea.hbm %s3315_s4, 1024 }
  0x7a   : > { %p2443_p5 = pneg %p2979_p7  ;;  %p2447_p8 = scmp.lt.u32.totalorder %s2975_s3, %s3315_s4 }
  0x7b   : > { %p2448_p9 = scmp.lt.u32.totalorder %s2446_s15, %s2441_s24  ;;  %p2450_p4 = scmp.lt.u32.totalorder %s2441_s24, %s2975_s3 }
  0x7c   : > { %p2444_p2 = pnand %p2443_p5, %p2442_p10 }
  0x7d   : > { %p2449_p13 = por %p2448_p9, %p2447_p8 }
  0x7e   : > { %p2445_p3 = pneg %p2444_p2 }
  0x7f   : > { %p2451_p1 = por %p2450_p4, %p2449_p13 }
  0x81   : > { %p2452_p6 = pnand %p2451_p1, %p2445_p3 }
  0x83   : > { %2455 = shalt.err (!%p2452_p6)
}
  0x84   : > { %s2456_s14 = scalar_lea.vmem %s2983_s13, 512  ;;  %s2639_s11 = smov [#allocation13]  }
  0x85   : > { %p2457_p11 = scmp.ne.s32.totalorder %s2983_s13, %s2456_s14  ;;  %s2461_s19 = sshll.u32 %s2639_s11, 4  ;;  %s2462_s19 = int_to_ptr.vmem [resolvable:$false] %s2461_s19 }
  0x86   : > { %s2463_s2 = scalar_lea.vmem %s2462_s19, 1024  ;;  %p2464_p2 = scmp.lt.s32.totalorder %s2983_s13, %s2462_s19 }
  0x87   : > { %p2459_p0 = pnand %p2457_p11, %p2443_p5  ;;  %p2465_p8 = scmp.lt.s32.totalorder %s2463_s2, %s2456_s14 }
  0x89   : > { %p2460_p10 = pneg %p2459_p0  ;;  %p2466_p9 = por %p2465_p8, %p2464_p2 }
  0x8b   : > { %p2467_p13 = pnand %p2466_p9, %p2460_p10 }
  0x8d   : > { %2470 = shalt.err (!%p2467_p13)
}
  0x8e   : > { %2198 = dma.hbm_to_vmem [thread:$0]  (!%p2979_p7), %s2975_s3, 512, %s2983_s13, %s2846_s22, %s3366_s23, %s3366_s23, %s3365_s7  }
  0x8f   : > { %p3373_p5 = scmp.ne.s32.totalorder %s3358_s16, 0 }
  0x90   : > { %s249_s24 = sand.u32 (!%p3373_p5), 1, %s2617_s30   ;;  %p3374_p3 = scmp.ne.s32.totalorder (!%p3373_p5), %s3361_s5, 0 }
  0x91   : > { %247 = sbr.rel (%p3373_p5) target bundleno = 1754 (0x6da), region = 32  ;;  %s2033_s8 = sshll.u32 (!%p3373_p5), %s249_s24, 5 }
  0x92   : > { %s250_s15 = scalar_lea.sflag (!%p3373_p5), [#allocation9], %s249_s24  ;;  %s3017_s20 = scalar_lea.vmem (!%p3373_p5), [#allocation8], %s2033_s8 }
  0x98   : > { %2560 = dma.done.wait (%p3374_p3), %s250_s15, 512  }
  0x99   : > { %2562 = vsyncadd (%p3374_p3), %s250_s15, 4294966784  ;;  %s258_s25 = sand.u32 1, %s2761_s10   ;;  %s260_s22 = sand.u32 1, %s2605_s1  }
  0x9a   : > { %s2034_s7 = sshll.u32 %s260_s22, 5  ;;  %s259_s16 = scalar_lea.sflag [#allocation12], %s258_s25 }
  0x9b   : > { %s3025_s23 = scalar_lea.vmem [#allocation11], %s2034_s7  ;;  %p3375_p7 = scmp.ne.s32.totalorder %s3347_s18, 0 }
  0x9d   : > { %2564 = dma.done.wait (%p3375_p7), %s259_s16, 512  }
  0x9e   : > { %2566 = vsyncadd (%p3375_p7), %s259_s16, 4294966784  ;;  %s269_s3 = sand.u32 1, %s2593_s26  }
  0x9f   : > { %s2035_s13 = sshll.u32 %s269_s3, 5 }
  0xa0   : > { %s3032_s5 = scalar_lea.vmem [#allocation13], %s2035_s13 }
  0xa1   : > { %2568 = dma.done.wait (%p2966_p12), %s259_s16, 512  }
  0xa2   : > { %2570 = vsyncadd (%p2966_p12), %s259_s16, 4294966784  ;;  %s3376_s10 = sld [smem:[#allocation20_spill]]  ;;  %s3039_s14 = sld [smem:[#allocation6]] }
  0xa3   : > { %s3041_s11 = sld [smem:[#allocation7]] }
  0xa8   : > { %s301_s21 = sand.u32 1, %s3376_s10  }
  0xa9   : > { %s2036_s18 = sshll.u32 %s301_s21, 5  ;;  %p2037_p4 = scmp.ne.s32.totalorder %s3041_s11, 0 }
  0xaa   : > { %s3045_s19 = scalar_lea.vmem [#allocation14], %s2036_s18  ;;  %vm314_vm0 = vcmask (!%p2037_p4), 7168   ;;  %vm323_vm1 = vcmask (!%p2037_p4), 64512   ;;  %v2640_v0 = vmov (!%p2037_p4), -inf   ;;  %v2641_v1 = vmov (!%p2037_p4), 0.0  }
  0xab   : > { %313 = sbr.rel (%p2037_p4) target bundleno = 178 (0xb2), region = 48  ;;  %315 = vst.msk [vmem:[#allocation2] sm:$0xff] (!%p2037_p4), %vm314_vm0, %v2640_v0  ;;  %316 = vst.msk [vmem:[#allocation2 + $0x8] sm:$0xff] (!%p2037_p4), %vm314_vm0, %v2640_v0 }
  0xac   : > { %317 = vst.msk [vmem:[#allocation2 + $0x10] sm:$0xff] (!%p2037_p4), %vm314_vm0, %v2640_v0  ;;  %318 = vst.msk [vmem:[#allocation2 + $0x18] sm:$0xff] (!%p2037_p4), %vm314_vm0, %v2640_v0 }
  0xad   : > { %319 = vst.msk [vmem:[#allocation3] sm:$0xff] (!%p2037_p4), %vm314_vm0, %v2641_v1  ;;  %320 = vst.msk [vmem:[#allocation3 + $0x8] sm:$0xff] (!%p2037_p4), %vm314_vm0, %v2641_v1 }
  0xae   : > { %321 = vst.msk [vmem:[#allocation3 + $0x10] sm:$0xff] (!%p2037_p4), %vm314_vm0, %v2641_v1  ;;  %322 = vst.msk [vmem:[#allocation3 + $0x18] sm:$0xff] (!%p2037_p4), %vm314_vm0, %v2641_v1 }
  0xaf   : > { %324 = vst.msk [vmem:[#allocation4] sm:$0xff] (!%p2037_p4), %vm323_vm1, %v2641_v1  ;;  %325 = vst.msk [vmem:[#allocation4 + $0x8] sm:$0xff] (!%p2037_p4), %vm323_vm1, %v2641_v1 }
  0xb0   : > { %326 = vst.msk [vmem:[#allocation4 + $0x10] sm:$0xff] (!%p2037_p4), %vm323_vm1, %v2641_v1  ;;  %327 = vst.msk [vmem:[#allocation4 + $0x18] sm:$0xff] (!%p2037_p4), %vm323_vm1, %v2641_v1 }
  0xb2 PF: > { %p2038_p12 = scmp.ge.s32.totalorder %s3041_s11, %s3039_s14 }
  0xb3   : > { %v336_v2 = vld [vmem:[%s3025_s23] sm:$0xff] (!%p2038_p12)  ;;  %vm344_vm2 = vcmask (!%p2038_p12), 64512   ;;  %v337_v3 = vld [vmem:[%s3025_s23 + $0x8] sm:$0xff] (!%p2038_p12)  ;;  %v2642_v4 = vmov (!%p2038_p12), 0.0   ;;  %vm2643_vm3 = vmmov (!%p2038_p12), 0   ;;  %v338_v7 = vld [vmem:[%s3025_s23 + $0x10] sm:$0xff] (!%p2038_p12) }
  0xb4   : > { %331 = sbr.rel (%p2038_p12) target bundleno = 911 (0x38f), region = 52  ;;  %2101 = vmatprep.subr.mxu0 (!%p2038_p12), %v2642_v4  ;;  %2103 = vmatprep.mubr.msk.f32.mxu0 (!%p2038_p12), %vm2643_vm3, %v2642_v4  ;;  %v332_v5 = vld [vmem:[%s3017_s20] sm:$0xff] (!%p2038_p12)  ;;  %v333_v6 = vld [vmem:[%s3017_s20 + $0x8] sm:$0xff] (!%p2038_p12)  ;;  %v339_v8 = vld [vmem:[%s3025_s23 + $0x18] sm:$0xff] (!%p2038_p12)  ;;  %v2644_v23 = vmov (!%p2038_p12), 0   ;;  %vm737_vm4 = vcmask (!%p2038_p12), 7168  }
  0xb5   : > { %2102 = vmatpush3.xpose.msk.msra.mxu0 (!%p2038_p12), %vm344_vm2, %v336_v2  ;;  %2106 = vmatprep.subr.mxu1 (!%p2038_p12), %v2642_v4  ;;  %v334_v9 = vld [vmem:[%s3017_s20 + $0x10] sm:$0xff] (!%p2038_p12)  ;;  %v335_v10 = vld [vmem:[%s3017_s20 + $0x18] sm:$0xff] (!%p2038_p12)  ;;  %v649_v24 = vld [vmem:[#allocation2] sm:$0xff] (!%p2038_p12) }
  0xb6   : > { %2107 = vmatpush3.xpose.msk.msra.mxu1 (!%p2038_p12), %vm344_vm2, %v337_v3  ;;  %2108 = vmatprep.mubr.msk.f32.mxu1 (!%p2038_p12), %vm2643_vm3, %v2642_v4  ;;  %v3088_v27 = vld [vmem:[#allocation2 + $0x8] sm:$0xff] (!%p2038_p12)  ;;  %v651_v28 = vld [vmem:[#allocation2 + $0x10] sm:$0xff] (!%p2038_p12)  ;;  %v3092_v35 = vld [vmem:[#allocation2 + $0x18] sm:$0xff] (!%p2038_p12) }
  0xb7   : > { %2111 = vmatprep.subr.mxu0 (!%p2038_p12), %v2642_v4  ;;  %2116 = vmatprep.subr.mxu1 (!%p2038_p12), %v2642_v4  ;;  %v340_v41 = vld [vmem:[%s3032_s5] sm:$0xff] (!%p2038_p12)  ;;  %v341_v43 = vld [vmem:[%s3032_s5 + $0x8] sm:$0xff] (!%p2038_p12)  ;;  %v342_v55 = vld [vmem:[%s3032_s5 + $0x10] sm:$0xff] (!%p2038_p12) }
  0xb8   : > { %2104 = vmatmul.mubr.msk.f32.vlgmr.msra.gmra.mrb[0].mxu0 (!%p2038_p12), %vm344_vm2, %v332_v5  ;;  %2337 = vset.pattern.permute.xlu0 (!%p2038_p12), %v2644_v23  ;;  %v343_v59 = vld [vmem:[%s3032_s5 + $0x18] sm:$0xff] (!%p2038_p12) }
  0xb9   : > { %2109 = vmatmul.mubr.msk.f32.vlgmr.msra.gmra.mrb[0].mxu1 (!%p2038_p12), %vm344_vm2, %v333_v6  ;;  %2112 = vmatpush3.xpose.msk.msra.mxu0 (!%p2038_p12), %vm344_vm2, %v338_v7 }
  0xba   : > { %2113 = vmatprep.mubr.msk.f32.mxu0 (!%p2038_p12), %vm2643_vm3, %v2642_v4  ;;  %2117 = vmatpush3.xpose.msk.msra.mxu1 (!%p2038_p12), %vm344_vm2, %v339_v8 }
  0xbb   : > { %2118 = vmatprep.mubr.msk.f32.mxu1 %vm2643_vm3, %v2642_v4  ;;  %2121 = vmatprep.subr.mxu0 %v2642_v4 }
  0xbc   : > { %2114 = vmatmul.mubr.msk.f32.vlgmr.msra.gmra.mrb[2].mxu0 %vm344_vm2, %v334_v9  ;;  %2126 = vmatprep.subr.mxu1 %v2642_v4  ;;  %v713_v9 = vld [vmem:[#allocation3] sm:$0xff] }
  0xbd   : > { %2119 = vmatmul.mubr.msk.f32.vlgmr.msra.gmra.mrb[2].mxu1 %vm344_vm2, %v335_v10  ;;  %2123 = vmatprep.mubr.msk.f32.mxu0 %vm2643_vm3, %v2642_v4 }
  0xbe   : > { %2128 = vmatprep.mubr.msk.f32.mxu1 %vm2643_vm3, %v2642_v4  ;;  %2338 = vset.pattern.permute.xlu1 %v2644_v23 }
  0xbf   : > { %2122 = vmatpush3.msra.mxu0 %v340_v41  ;;  %2127 = vmatpush3.msra.mxu1 %v341_v43 }
  0xc0   : > { %2131 = vmatprep.subr.mxu0 %v2642_v4  ;;  %2136 = vmatprep.subr.mxu1 %v2642_v4 }
 0x18b   : > { %v417_v11 = vpop.f32.mrb[0].mxu0 }
 0x18c   : > { %v2105_v12 = vpop.f32.mrb[1].mxu0  ;;  %v653_v13 = vsel %vm344_vm2, %v417_v11, -inf  ;;  %v493_v14 = vpop.f32.mrb[0].mxu1 }
 0x18d   : > { %654 = vmax.xlane.f32.xlu0 %v653_v13  ;;  %v2110_v15 = vpop.f32.mrb[1].mxu1  ;;  %v656_v16 = vsel %vm344_vm2, %v493_v14, -inf  ;;  %v714_v12 = vld [vmem:[#allocation3 + $0x8] sm:$0xff] }
 0x18f   : > { %v569_v17 = vpop.f32.mrb[2].mxu0 }
 0x190   : > { %v2115_v18 = vpop.f32.mrb[3].mxu0  ;;  %v659_v19 = vsel %vm344_vm2, %v569_v17, -inf  ;;  %v645_v20 = vpop.f32.mrb[2].mxu1 }
 0x191   : > { %657 = vmax.xlane.f32.xlu0 %v656_v16  ;;  %660 = vmax.xlane.f32.xlu1 %v659_v19  ;;  %v2120_v21 = vpop.f32.mrb[3].mxu1  ;;  %v662_v22 = vsel %vm344_vm2, %v645_v20, -inf  ;;  %v715_v18 = vld [vmem:[#allocation3 + $0x10] sm:$0xff] }
 0x192   : > { %v716_v21 = vld [vmem:[#allocation3 + $0x18] sm:$0xff] }
 0x195   : > { %663 = vmax.xlane.f32.xlu1 %v662_v22 }
 0x21a   : > { %v655_v25 = vpop.xlane.xlu0 %654 }
 0x21b   : > { %v665_v26 = vmax.f32 %v649_v24, %v655_v25 }
 0x21d   : > { %v669_v29 = vsub.f32 %v649_v24, %v665_v26  ;;  %1070 = vst.msk [vmem:[#allocation2] sm:$0xff] %vm737_vm4, %v665_v26  ;;  %683 = vperm.xlu0 %2337, %v665_v26   ;;  %v1034_v26 = vld [vmem:[#allocation4] sm:$0xff] }
 0x21e   : > { %v658_v30 = vpop.xlane.xlu0 %657  ;;  %v661_v31 = vpop.xlane.xlu1 %660 }
 0x21f   : > { %v673_v32 = vmul.f32 1.442695, %v669_v29  ;;  %v666_v33 = vmax.f32 %v3088_v27, %v658_v30  ;;  %v667_v34 = vmax.f32 %v651_v28, %v661_v31 }
 0x221   : > { %2339 = vpow2.f32 %v673_v32  ;;  %v670_v36 = vsub.f32 %v3088_v27, %v666_v33  ;;  %1071 = vst.msk [vmem:[#allocation2 + $0x8] sm:$0xff] %vm737_vm4, %v666_v33  ;;  %688 = vperm.xlu1 %2338, %v666_v33   ;;  %v671_v37 = vsub.f32 %v651_v28, %v667_v34  ;;  %1072 = vst.msk [vmem:[#allocation2 + $0x10] sm:$0xff] %vm737_vm4, %v667_v34  ;;  %v1035_v28 = vld [vmem:[#allocation4 + $0x8] sm:$0xff] }
 0x222   : > { %v664_v38 = vpop.xlane.xlu1 %663 }
 0x223   : > { %v668_v39 = vmax.f32 %v3092_v35, %v664_v38  ;;  %v677_v61 = vmul.f32 1.442695, %v671_v37  ;;  %v675_v1 = vmul.f32 1.442695, %v670_v36 }
 0x225   : > { %693 = vperm.xlu1 %2338, %v667_v34   ;;  %v672_v40 = vsub.f32 %v3092_v35, %v668_v39  ;;  %1073 = vst.msk [vmem:[#allocation2 + $0x18] sm:$0xff] %vm737_vm4, %v668_v39  ;;  %v1036_v34 = vld [vmem:[#allocation4 + $0x10] sm:$0xff] }
 0x229   : > { %698 = vperm.xlu1 %2338, %v668_v39   ;;  %v1037_v39 = vld [vmem:[#allocation4 + $0x18] sm:$0xff] }
 0x22b   : > { %v2340_v42 = vpop.eup %2339 }
 0x22c   : > { %v717_v10 = vmul.f32 %v2340_v42, %v713_v9 }
 0x22d   : > { %1040 = vperm.xlu1 %2338, %v2340_v42  }
 0x29c   : > { %v684_v44 = vpop.permute.xlu0 %683 }
 0x29d   : > { %v701_v45 = vsub.f32 %v417_v11, %v684_v44 }
 0x29f   : > { %v705_v46 = vmul.f32 1.442695, %v701_v45 }
 0x2a0   : > { %v689_v47 = vpop.permute.xlu1 %688 }
 0x2a1   : > { %2341 = vpow2.f32 %v705_v46  ;;  %v702_v48 = vsub.f32 %v493_v14, %v689_v47 }
 0x2a3   : > { %v707_v49 = vmul.f32 1.442695, %v702_v48 }
 0x2a4   : > { %v694_v50 = vpop.permute.xlu1 %693 }
 0x2a5   : > { %2343 = vpow2.f32 %v707_v49  ;;  %v703_v51 = vsub.f32 %v569_v17, %v694_v50 }
 0x2a7   : > { %v709_v52 = vmul.f32 1.442695, %v703_v51 }
 0x2a8   : > { %v699_v53 = vpop.permute.xlu1 %698 }
 0x2a9   : > { %2345 = vpow2.f32 %v709_v52  ;;  %v704_v54 = vsub.f32 %v645_v20, %v699_v53 }
 0x2ab   : > { %v2342_v56 = vpop.eup %2341  ;;  %v711_v57 = vmul.f32 1.442695, %v704_v54 }
 0x2ac   : > { %2124 = vmatmul.mubr.msk.f32.vlgmr.msra.gmra.mrb[4].mxu0 %vm344_vm2, %v2342_v56  ;;  %v721_v58 = vsel %vm344_vm2, %v2342_v56, 0.0  ;;  %v1041_v8 = vpop.permute.xlu1 %1040 }
 0x2ad   : > { %2347 = vpow2.f32 %v711_v57  ;;  %722 = vadd.xlane.f32.xlu1 %v721_v58  ;;  %2132 = vmatpush3.msra.mxu0 %v342_v55  ;;  %v1058_v27 = vmul.f32 %v1041_v8, %v1034_v26 }
 0x2ae   : > { %2133 = vmatprep.mubr.msk.f32.mxu0 %vm2643_vm3, %v2642_v4  ;;  %2349 = vpow2.f32 %v677_v61 }
 0x2af   : > { %v2344_v60 = vpop.eup %2343  ;;  %2351 = vpow2.f32 %v675_v1 }
 0x2b0   : > { %2129 = vmatmul.mubr.msk.f32.vlgmr.msra.gmra.mrb[4].mxu1 %vm344_vm2, %v2344_v60  ;;  %v724_v62 = vsel %vm344_vm2, %v2344_v60, 0.0 }
 0x2b1   : > { %725 = vadd.xlane.f32.xlu0 %v724_v62  ;;  %2137 = vmatpush3.msra.mxu1 %v343_v59 }
 0x2b2   : > { %2138 = vmatprep.mubr.msk.f32.mxu1 %vm2643_vm3, %v2642_v4  ;;  %v679_v4 = vmul.f32 1.442695, %v672_v40 }
 0x2b3   : > { %v2346_v63 = vpop.eup %2345 }
 0x2b4   : > { %2134 = vmatmul.mubr.msk.f32.vlgmr.msra.gmra.mrb[6].mxu0 %vm344_vm2, %v2346_v63  ;;  %v727_v5 = vsel %vm344_vm2, %v2346_v63, 0.0  ;;  %2353 = vpow2.f32 %v679_v4 }
 0x2b7   : > { %v2348_v0 = vpop.eup %2347 }
 0x2b8   : > { %2139 = vmatmul.mubr.msk.f32.vlgmr.msra.gmra.mrb[6].mxu1 %vm344_vm2, %v2348_v0  ;;  %v2350_v2 = vpop.eup %2349  ;;  %v730_v6 = vsel %vm344_vm2, %v2348_v0, 0.0 }
 0x2b9   : > { %v2352_v3 = vpop.eup %2351  ;;  %v719_v19 = vmul.f32 %v2350_v2, %v715_v18 }
 0x2ba   : > { %v718_v14 = vmul.f32 %v2352_v3, %v714_v12 }
 0x2be   : > { %1050 = vperm.xlu1 %2338, %v2350_v2   ;;  %v2354_v7 = vpop.eup %2353 }
 0x2bf   : > { %v720_v23 = vmul.f32 %v2354_v7, %v716_v21 }
 0x2c7   : > { %1045 = vperm.xlu0 %2337, %v2352_v3  }
 0x2e2   : > { %728 = vadd.xlane.f32.xlu1 %v727_v5 }
 0x2e6   : > { %731 = vadd.xlane.f32.xlu1 %v730_v6 }
 0x2f7   : > { %1055 = vperm.xlu1 %2338, %v2354_v7  }
 0x33a   : > { %v723_v11 = vpop.xlane.xlu1 %722 }
 0x33b   : > { %v733_v13 = vadd.f32 %v723_v11, %v717_v10 }
 0x33d   : > { %738 = vst.msk [vmem:[#allocation3] sm:$0xff] %vm737_vm4, %v733_v13 }
 0x33e   : > { %v726_v15 = vpop.xlane.xlu0 %725  ;;  %v1051_v17 = vpop.permute.xlu1 %1050 }
 0x33f   : > { %v734_v16 = vadd.f32 %v726_v15, %v718_v14  ;;  %v1060_v38 = vmul.f32 %v1051_v17, %v1036_v34 }
 0x341   : > { %739 = vst.msk [vmem:[#allocation3 + $0x8] sm:$0xff] %vm737_vm4, %v734_v16 }
 0x346   : > { %v1046_v29 = vpop.permute.xlu0 %1045 }
 0x347   : > { %v1059_v33 = vmul.f32 %v1046_v29, %v1035_v28 }
 0x36f   : > { %v729_v20 = vpop.xlane.xlu1 %728 }
 0x370   : > { %v735_v22 = vadd.f32 %v729_v20, %v719_v19 }
 0x372   : > { %740 = vst.msk [vmem:[#allocation3 + $0x10] sm:$0xff] %vm737_vm4, %v735_v22 }
 0x373   : > { %v732_v24 = vpop.xlane.xlu1 %731 }
 0x374   : > { %v736_v25 = vadd.f32 %v732_v24, %v720_v23 }
 0x376   : > { %741 = vst.msk [vmem:[#allocation3 + $0x18] sm:$0xff] %vm737_vm4, %v736_v25 }
 0x377   : > { %v1056_v40 = vpop.permute.xlu1 %1055 }
 0x378   : > { %v1061_v44 = vmul.f32 %v1056_v40, %v1037_v39 }
 0x37f   : > { %v811_v30 = vpop.f32.mrb[4].mxu0 }
 0x380   : > { %v1062_v31 = vadd.f32 %v1058_v27, %v811_v30  ;;  %v2125_v32 = vpop.f32.mrb[5].mxu0 }
 0x382   : > { %1066 = vst.msk [vmem:[#allocation4] sm:$0xff] %vm344_vm2, %v1062_v31 }
 0x383   : > { %v884_v35 = vpop.f32.mrb[4].mxu1 }
 0x384   : > { %v1063_v36 = vadd.f32 %v1059_v33, %v884_v35  ;;  %v2130_v37 = vpop.f32.mrb[5].mxu1 }
 0x386   : > { %1067 = vst.msk [vmem:[#allocation4 + $0x8] sm:$0xff] %vm344_vm2, %v1063_v36 }
 0x387   : > { %v957_v41 = vpop.f32.mrb[6].mxu0 }
 0x388   : > { %v1064_v42 = vadd.f32 %v1060_v38, %v957_v41  ;;  %v2135_v43 = vpop.f32.mrb[7].mxu0 }
 0x38a   : > { %1068 = vst.msk [vmem:[#allocation4 + $0x10] sm:$0xff] %vm344_vm2, %v1064_v42 }
 0x38b   : > { %v1030_v45 = vpop.f32.mrb[6].mxu1 }
 0x38c   : > { %v1065_v46 = vadd.f32 %v1061_v44, %v1030_v45  ;;  %v2140_v47 = vpop.f32.mrb[7].mxu1 }
 0x38e   : > { %1069 = vst.msk [vmem:[#allocation4 + $0x18] sm:$0xff] %vm344_vm2, %v1065_v46 }
 0x38f PF: > { %p2051_p1 = scmp.ne.s32.totalorder %s3041_s11, %s3039_s14 }
 0x390   : > { %v1082_v48 = vld [vmem:[%s3025_s23] sm:$0xff] (!%p2051_p1)  ;;  %vm1090_vm5 = vcmask (!%p2051_p1), 64512   ;;  %v1083_v49 = vld [vmem:[%s3025_s23 + $0x8] sm:$0xff] (!%p2051_p1)  ;;  %v2645_v50 = vmov (!%p2051_p1), 0.0   ;;  %vm2646_vm6 = vmmov (!%p2051_p1), 0   ;;  %v1084_v53 = vld [vmem:[%s3025_s23 + $0x10] sm:$0xff] (!%p2051_p1)  ;;  %v1395_v57 = vlaneseq (!%p2051_p1) }
 0x391   : > { %1077 = sbr.rel (%p2051_p1) target bundleno = 1725 (0x6bd), region = 56  ;;  %2141 = vmatprep.subr.mxu0 (!%p2051_p1), %v2645_v50  ;;  %2143 = vmatprep.mubr.msk.f32.mxu0 (!%p2051_p1), %vm2646_vm6, %v2645_v50  ;;  %v1078_v51 = vld [vmem:[%s3017_s20] sm:$0xff] (!%p2051_p1)  ;;  %v1079_v52 = vld [vmem:[%s3017_s20 + $0x8] sm:$0xff] (!%p2051_p1)  ;;  %v1085_v54 = vld [vmem:[%s3025_s23 + $0x18] sm:$0xff] (!%p2051_p1)  ;;  %v2647_v12 = vmov (!%p2051_p1), 0   ;;  %vm1494_vm8 = vcmask (!%p2051_p1), 7168  }
 0x392   : > { %2142 = vmatpush3.xpose.msk.msra.mxu0 (!%p2051_p1), %vm1090_vm5, %v1082_v48  ;;  %2146 = vmatprep.subr.mxu1 (!%p2051_p1), %v2645_v50  ;;  %v1080_v55 = vld [vmem:[%s3017_s20 + $0x10] sm:$0xff] (!%p2051_p1)  ;;  %v1081_v56 = vld [vmem:[%s3017_s20 + $0x18] sm:$0xff] (!%p2051_p1)  ;;  %v1396_v58 = vshrl.u32 (!%p2051_p1), %v1395_v57, 7  ;;  %v1398_v59 = vand.u32 (!%p2051_p1), 127, %v1395_v57  ;;  %v3166_v13 = vld [vmem:[#allocation2] sm:$0xff] (!%p2051_p1) }
 0x393   : > { %2147 = vmatpush3.xpose.msk.msra.mxu1 (!%p2051_p1), %vm1090_vm5, %v1083_v49  ;;  %2148 = vmatprep.mubr.msk.f32.mxu1 (!%p2051_p1), %vm2646_vm6, %v2645_v50  ;;  %v1407_v16 = vld [vmem:[#allocation2 + $0x8] sm:$0xff] (!%p2051_p1)  ;;  %v3171_v17 = vld [vmem:[#allocation2 + $0x10] sm:$0xff] (!%p2051_p1)  ;;  %v1409_v23 = vld [vmem:[#allocation2 + $0x18] sm:$0xff] (!%p2051_p1) }
 0x394   : > { %2151 = vmatprep.subr.mxu0 (!%p2051_p1), %v2645_v50  ;;  %2156 = vmatprep.subr.mxu1 (!%p2051_p1), %v2645_v50  ;;  %vm1399_vm7 = vcmp.le.s32.totalorder (!%p2051_p1), %v1398_v59, %v1396_v58  ;;  %v1086_v29 = vld [vmem:[%s3032_s5] sm:$0xff] (!%p2051_p1)  ;;  %v1087_v30 = vld [vmem:[%s3032_s5 + $0x8] sm:$0xff] (!%p2051_p1)  ;;  %v1088_v42 = vld [vmem:[%s3032_s5 + $0x10] sm:$0xff] (!%p2051_p1) }
 0x395   : > { %2144 = vmatmul.mubr.msk.f32.vlgmr.msra.gmra.mrb[0].mxu0 (!%p2051_p1), %vm1090_vm5, %v1078_v51  ;;  %2355 = vset.pattern.permute.xlu0 (!%p2051_p1), %v2647_v12  ;;  %v1089_v46 = vld [vmem:[%s3032_s5 + $0x18] sm:$0xff] (!%p2051_p1) }
 0x396   : > { %2149 = vmatmul.mubr.msk.f32.vlgmr.msra.gmra.mrb[0].mxu1 (!%p2051_p1), %vm1090_vm5, %v1079_v52  ;;  %2152 = vmatpush3.xpose.msk.msra.mxu0 (!%p2051_p1), %vm1090_vm5, %v1084_v53 }
 0x397   : > { %2153 = vmatprep.mubr.msk.f32.mxu0 (!%p2051_p1), %vm2646_vm6, %v2645_v50  ;;  %2157 = vmatpush3.xpose.msk.msra.mxu1 (!%p2051_p1), %vm1090_vm5, %v1085_v54 }
 0x398   : > { %2158 = vmatprep.mubr.msk.f32.mxu1 %vm2646_vm6, %v2645_v50  ;;  %2161 = vmatprep.subr.mxu0 %v2645_v50 }
 0x399   : > { %2154 = vmatmul.mubr.msk.f32.vlgmr.msra.gmra.mrb[2].mxu0 %vm1090_vm5, %v1080_v55  ;;  %2166 = vmatprep.subr.mxu1 %v2645_v50 }
 0x39a   : > { %2159 = vmatmul.mubr.msk.f32.vlgmr.msra.gmra.mrb[2].mxu1 %vm1090_vm5, %v1081_v56  ;;  %2163 = vmatprep.mubr.msk.f32.mxu0 %vm2646_vm6, %v2645_v50 }
 0x39b   : > { %2168 = vmatprep.mubr.msk.f32.mxu1 %vm2646_vm6, %v2645_v50  ;;  %2356 = vset.pattern.permute.xlu1 %v2647_v12 }
 0x39c   : > { %2162 = vmatpush3.msra.mxu0 %v1086_v29  ;;  %2167 = vmatpush3.msra.mxu1 %v1087_v30 }
 0x39d   : > { %2171 = vmatprep.subr.mxu0 %v2645_v50  ;;  %2176 = vmatprep.subr.mxu1 %v2645_v50 }
 0x468   : > { %v1163_v60 = vpop.f32.mrb[0].mxu0 }
 0x469   : > { %v1402_v61 = vsel %vm1399_vm7, %v1163_v60, -inf  ;;  %v2145_v62 = vpop.f32.mrb[1].mxu0  ;;  %v1239_v63 = vpop.f32.mrb[0].mxu1 }
 0x46a   : > { %v1403_v0 = vsel %vm1399_vm7, %v1239_v63, -inf  ;;  %v1410_v1 = vsel %vm1090_vm5, %v1402_v61, -inf  ;;  %v2150_v2 = vpop.f32.mrb[1].mxu1 }
 0x46b   : > { %1411 = vmax.xlane.f32.xlu0 %v1410_v1  ;;  %v1413_v3 = vsel %vm1090_vm5, %v1403_v0, -inf }
 0x46c   : > { %v1315_v5 = vpop.f32.mrb[2].mxu0 }
 0x46d   : > { %v1404_v6 = vsel %vm1399_vm7, %v1315_v5, -inf  ;;  %v2155_v4 = vpop.f32.mrb[3].mxu0  ;;  %v1391_v7 = vpop.f32.mrb[2].mxu1  ;;  %v1472_v5 = vld [vmem:[#allocation3 + $0x10] sm:$0xff] }
 0x46e   : > { %v1405_v8 = vsel %vm1399_vm7, %v1391_v7, -inf  ;;  %v1416_v9 = vsel %vm1090_vm5, %v1404_v6, -inf  ;;  %v2160_v10 = vpop.f32.mrb[3].mxu1 }
 0x46f   : > { %1414 = vmax.xlane.f32.xlu0 %v1413_v3  ;;  %1417 = vmax.xlane.f32.xlu1 %v1416_v9  ;;  %v1419_v11 = vsel %vm1090_vm5, %v1405_v8, -inf }
 0x473   : > { %1420 = vmax.xlane.f32.xlu1 %v1419_v11 }
 0x4f8   : > { %v1412_v14 = vpop.xlane.xlu0 %1411 }
 0x4f9   : > { %v3169_v15 = vmax.f32 %v3166_v13, %v1412_v14 }
 0x4fb   : > { %v1426_v18 = vsub.f32 %v3166_v13, %v3169_v15  ;;  %1827 = vst.msk [vmem:[#allocation2] sm:$0xff] %vm1494_vm8, %v3169_v15  ;;  %1440 = vperm.xlu0 %2355, %v3169_v15  }
 0x4fc   : > { %v1415_v19 = vpop.xlane.xlu0 %1414  ;;  %v1418_v20 = vpop.xlane.xlu1 %1417 }
 0x4fd   : > { %v1423_v21 = vmax.f32 %v1407_v16, %v1415_v19  ;;  %v1424_v22 = vmax.f32 %v3171_v17, %v1418_v20  ;;  %v1430_v55 = vmul.f32 1.442695, %v1426_v18 }
 0x4ff   : > { %v1427_v24 = vsub.f32 %v1407_v16, %v1423_v21  ;;  %1828 = vst.msk [vmem:[#allocation2 + $0x8] sm:$0xff] %vm1494_vm8, %v1423_v21  ;;  %1445 = vperm.xlu1 %2356, %v1423_v21   ;;  %v1428_v25 = vsub.f32 %v3171_v17, %v1424_v22  ;;  %1829 = vst.msk [vmem:[#allocation2 + $0x10] sm:$0xff] %vm1494_vm8, %v1424_v22  ;;  %v1791_v21 = vld [vmem:[#allocation4] sm:$0xff] }
 0x500   : > { %v1421_v26 = vpop.xlane.xlu1 %1420 }
 0x501   : > { %v1425_v27 = vmax.f32 %v1409_v23, %v1421_v26  ;;  %v1432_v53 = vmul.f32 1.442695, %v1427_v24  ;;  %v1792_v24 = vld [vmem:[#allocation4 + $0x8] sm:$0xff] }
 0x503   : > { %1450 = vperm.xlu1 %2356, %v1424_v22   ;;  %v1429_v28 = vsub.f32 %v1409_v23, %v1425_v27  ;;  %1830 = vst.msk [vmem:[#allocation2 + $0x18] sm:$0xff] %vm1494_vm8, %v1425_v27 }
 0x505   : > { %v1436_v56 = vmul.f32 1.442695, %v1429_v28 }
 0x507   : > { %1455 = vperm.xlu1 %2356, %v1425_v27  }
 0x57a   : > { %v1441_v31 = vpop.permute.xlu0 %1440 }
 0x57b   : > { %v1458_v32 = vsub.f32 %v1402_v61, %v1441_v31  ;;  %v1470_v61 = vld [vmem:[#allocation3] sm:$0xff]  ;;  %v1793_v31 = vld [vmem:[#allocation4 + $0x10] sm:$0xff] }
 0x57d   : > { %v1462_v33 = vmul.f32 1.442695, %v1458_v32 }
 0x57e   : > { %v1446_v34 = vpop.permute.xlu1 %1445 }
 0x57f   : > { %2357 = vpow2.f32 %v1462_v33  ;;  %v1459_v35 = vsub.f32 %v1403_v0, %v1446_v34  ;;  %v1471_v0 = vld [vmem:[#allocation3 + $0x8] sm:$0xff] }
 0x581   : > { %v1464_v36 = vmul.f32 1.442695, %v1459_v35 }
 0x582   : > { %v1451_v37 = vpop.permute.xlu1 %1450 }
 0x583   : > { %2359 = vpow2.f32 %v1464_v36  ;;  %v1460_v38 = vsub.f32 %v1404_v6, %v1451_v37  ;;  %v1794_v36 = vld [vmem:[#allocation4 + $0x18] sm:$0xff] }
 0x585   : > { %v1466_v39 = vmul.f32 1.442695, %v1460_v38 }
 0x586   : > { %v1456_v40 = vpop.permute.xlu1 %1455 }
 0x587   : > { %2361 = vpow2.f32 %v1466_v39  ;;  %v1461_v41 = vsub.f32 %v1405_v8, %v1456_v40  ;;  %v1473_v8 = vld [vmem:[#allocation3 + $0x18] sm:$0xff] }
 0x589   : > { %v2358_v43 = vpop.eup %2357  ;;  %v1468_v44 = vmul.f32 1.442695, %v1461_v41 }
 0x58a   : > { %2164 = vmatmul.mubr.msk.f32.vlgmr.msra.gmra.mrb[4].mxu0 %vm1090_vm5, %v2358_v43  ;;  %v1478_v45 = vsel %vm1090_vm5, %v2358_v43, 0.0 }
 0x58b   : > { %2363 = vpow2.f32 %v1468_v44  ;;  %1479 = vadd.xlane.f32.xlu1 %v1478_v45  ;;  %2172 = vmatpush3.msra.mxu0 %v1088_v42 }
 0x58c   : > { %2173 = vmatprep.mubr.msk.f32.mxu0 %vm2646_vm6, %v2645_v50  ;;  %2365 = vpow2.f32 %v1432_v53 }
 0x58d   : > { %v2360_v47 = vpop.eup %2359  ;;  %2367 = vpow2.f32 %v1430_v55 }
 0x58e   : > { %2169 = vmatmul.mubr.msk.f32.vlgmr.msra.gmra.mrb[4].mxu1 %vm1090_vm5, %v2360_v47  ;;  %v1481_v48 = vsel %vm1090_vm5, %v2360_v47, 0.0 }
 0x58f   : > { %1482 = vadd.xlane.f32.xlu0 %v1481_v48  ;;  %2177 = vmatpush3.msra.mxu1 %v1089_v46 }
 0x590   : > { %2178 = vmatprep.mubr.msk.f32.mxu1 %vm2646_vm6, %v2645_v50  ;;  %v1434_v50 = vmul.f32 1.442695, %v1428_v25 }
 0x591   : > { %v2362_v49 = vpop.eup %2361 }
 0x592   : > { %2174 = vmatmul.mubr.msk.f32.vlgmr.msra.gmra.mrb[6].mxu0 %vm1090_vm5, %v2362_v49  ;;  %v1484_v51 = vsel %vm1090_vm5, %v2362_v49, 0.0  ;;  %2369 = vpow2.f32 %v1434_v50 }
 0x593   : > { %1485 = vadd.xlane.f32.xlu1 %v1484_v51  ;;  %2371 = vpow2.f32 %v1436_v56 }
 0x595   : > { %v2364_v52 = vpop.eup %2363 }
 0x596   : > { %2179 = vmatmul.mubr.msk.f32.vlgmr.msra.gmra.mrb[6].mxu1 %vm1090_vm5, %v2364_v52  ;;  %v1487_v54 = vsel %vm1090_vm5, %v2364_v52, 0.0  ;;  %v2366_v57 = vpop.eup %2365 }
 0x597   : > { %1488 = vadd.xlane.f32.xlu1 %v1487_v54  ;;  %v2368_v58 = vpop.eup %2367  ;;  %v1475_v2 = vmul.f32 %v2366_v57, %v1471_v0 }
 0x598   : > { %v1474_v62 = vmul.f32 %v2368_v58, %v1470_v61 }
 0x59c   : > { %v2370_v59 = vpop.eup %2369 }
 0x59d   : > { %v2372_v60 = vpop.eup %2371  ;;  %v1476_v4 = vmul.f32 %v2370_v59, %v1472_v5 }
 0x59e   : > { %v1477_v11 = vmul.f32 %v2372_v60, %v1473_v8 }
 0x5a5   : > { %1802 = vperm.xlu0 %2355, %v2366_v57  }
 0x5a8   : > { %1797 = vperm.xlu1 %2356, %v2368_v58  }
 0x5ac   : > { %1807 = vperm.xlu1 %2356, %v2370_v59  }
 0x5b0   : > { %1812 = vperm.xlu1 %2356, %v2372_v60  }
 0x618   : > { %v1480_v63 = vpop.xlane.xlu1 %1479 }
 0x619   : > { %v1490_v1 = vadd.f32 %v1480_v63, %v1474_v62 }
 0x61b   : > { %1495 = vst.msk [vmem:[#allocation3] sm:$0xff] %vm1494_vm8, %v1490_v1 }
 0x61c   : > { %v1483_v3 = vpop.xlane.xlu0 %1482 }
 0x61d   : > { %v1491_v6 = vadd.f32 %v1483_v3, %v1475_v2 }
 0x61f   : > { %1496 = vst.msk [vmem:[#allocation3 + $0x8] sm:$0xff] %vm1494_vm8, %v1491_v6 }
 0x620   : > { %v1486_v7 = vpop.xlane.xlu1 %1485 }
 0x621   : > { %v1492_v9 = vadd.f32 %v1486_v7, %v1476_v4 }
 0x622   : > { %v1831_v10 = vld [vmem:[#allocation3] sm:$0xff] }
 0x623   : > { %1497 = vst.msk [vmem:[#allocation3 + $0x10] sm:$0xff] %vm1494_vm8, %v1492_v9  ;;  %2373 = vrcp.f32 %v1831_v10 }
 0x624   : > { %v1489_v12 = vpop.xlane.xlu1 %1488  ;;  %v1803_v25 = vpop.permute.xlu0 %1802 }
 0x625   : > { %v1493_v13 = vadd.f32 %v1489_v12, %v1477_v11  ;;  %v1816_v30 = vmul.f32 %v1803_v25, %v1792_v24 }
 0x626   : > { %v1832_v14 = vld [vmem:[#allocation3 + $0x8] sm:$0xff] }
 0x627   : > { %1498 = vst.msk [vmem:[#allocation3 + $0x18] sm:$0xff] %vm1494_vm8, %v1493_v13  ;;  %2375 = vrcp.f32 %v1832_v14 }
 0x628   : > { %v1798_v22 = vpop.permute.xlu1 %1797 }
 0x629   : > { %v1815_v23 = vmul.f32 %v1798_v22, %v1791_v21 }
 0x62a   : > { %v1833_v15 = vld [vmem:[#allocation3 + $0x10] sm:$0xff] }
 0x62b   : > { %2377 = vrcp.f32 %v1833_v15 }
 0x62c   : > { %v1808_v29 = vpop.permute.xlu1 %1807 }
 0x62d   : > { %v2374_v16 = vpop.eup %2373  ;;  %v1817_v35 = vmul.f32 %v1808_v29, %v1793_v31 }
 0x62e   : > { %1845 = vperm.xlu1 %2356, %v2374_v16   ;;  %v1834_v17 = vld [vmem:[#allocation3 + $0x18] sm:$0xff] }
 0x62f   : > { %2379 = vrcp.f32 %v1834_v17 }
 0x630   : > { %v1813_v37 = vpop.permute.xlu1 %1812 }
 0x631   : > { %v2376_v18 = vpop.eup %2375  ;;  %v1818_v41 = vmul.f32 %v1813_v37, %v1794_v36 }
 0x632   : > { %1850 = vperm.xlu0 %2355, %v2376_v18  }
 0x635   : > { %v2378_v19 = vpop.eup %2377 }
 0x636   : > { %1855 = vperm.xlu1 %2356, %v2378_v19  }
 0x639   : > { %v2380_v20 = vpop.eup %2379 }
 0x63a   : > { %1860 = vperm.xlu0 %2355, %v2380_v20  }
 0x65d   : > { %v1568_v26 = vpop.f32.mrb[4].mxu0 }
 0x65e   : > { %v1819_v27 = vadd.f32 %v1815_v23, %v1568_v26  ;;  %v2165_v28 = vpop.f32.mrb[5].mxu0 }
 0x660   : > { %1823 = vst.msk [vmem:[#allocation4] sm:$0xff] %vm1090_vm5, %v1819_v27 }
 0x661   : > { %v1641_v32 = vpop.f32.mrb[4].mxu1 }
 0x662   : > { %v1820_v33 = vadd.f32 %v1816_v30, %v1641_v32  ;;  %v2170_v34 = vpop.f32.mrb[5].mxu1 }
 0x664   : > { %1824 = vst.msk [vmem:[#allocation4 + $0x8] sm:$0xff] %vm1090_vm5, %v1820_v33 }
 0x665   : > { %v1714_v38 = vpop.f32.mrb[6].mxu0 }
 0x666   : > { %v1821_v39 = vadd.f32 %v1817_v35, %v1714_v38  ;;  %v2175_v40 = vpop.f32.mrb[7].mxu0 }
 0x667   : > { %v1839_v46 = vld [vmem:[#allocation4] sm:$0xff] }
 0x668   : > { %1825 = vst.msk [vmem:[#allocation4 + $0x10] sm:$0xff] %vm1090_vm5, %v1821_v39 }
 0x669   : > { %v1787_v42 = vpop.f32.mrb[6].mxu1 }
 0x66a   : > { %v1822_v43 = vadd.f32 %v1818_v41, %v1787_v42  ;;  %v2180_v44 = vpop.f32.mrb[7].mxu1 }
 0x66b   : > { %v1840_v48 = vld [vmem:[#allocation4 + $0x8] sm:$0xff] }
 0x66c   : > { %1826 = vst.msk [vmem:[#allocation4 + $0x18] sm:$0xff] %vm1090_vm5, %v1822_v43 }
 0x66f   : > { %v1841_v53 = vld [vmem:[#allocation4 + $0x10] sm:$0xff] }
 0x673   : > { %v1842_v50 = vld [vmem:[#allocation4 + $0x18] sm:$0xff] }
 0x6ad   : > { %v1846_v45 = vpop.permute.xlu1 %1845 }
 0x6ae   : > { %v1863_v47 = vmul.f32 %v1846_v45, %v1839_v46 }
 0x6b0   : > { %1867 = vst.msk [vmem:[%s3045_s19] sm:$0xff] %vm1090_vm5, %v1863_v47 }
 0x6b1   : > { %v1851_v49 = vpop.permute.xlu0 %1850 }
 0x6b2   : > { %v1864_v51 = vmul.f32 %v1851_v49, %v1840_v48 }
 0x6b4   : > { %1868 = vst.msk [vmem:[%s3045_s19 + $0x8] sm:$0xff] %vm1090_vm5, %v1864_v51 }
 0x6b5   : > { %v1856_v52 = vpop.permute.xlu1 %1855 }
 0x6b6   : > { %v1865_v54 = vmul.f32 %v1856_v52, %v1841_v53 }
 0x6b8   : > { %1869 = vst.msk [vmem:[%s3045_s19 + $0x10] sm:$0xff] %vm1090_vm5, %v1865_v54 }
 0x6b9   : > { %v1861_v55 = vpop.permute.xlu0 %1860 }
 0x6ba   : > { %v1866_v56 = vmul.f32 %v1861_v55, %v1842_v50 }
 0x6bc   : > { %1870 = vst.msk [vmem:[%s3045_s19 + $0x18] sm:$0xff] %vm1090_vm5, %v1866_v56 }
 0x6bd PF: > { %s1879_s27 = sld [smem:[#allocation6]]  ;;  %s3377_s2 = sld [smem:[#allocation22_spill]] }
 0x6be   : > { %s3379_s8 = sld [smem:[#allocation27_spill]]  ;;  %s1887_s15 = sshll.u32 %s3045_s19, 4  ;;  %s3222_s15 = int_to_ptr.vmem [resolvable:$true] %s1887_s15 }
 0x6bf   : > { %s3380_s23 = sld [smem:[#allocation30_spill]]  ;;  %s3231_s5 = scalar_lea.sflag [#allocation10], %s301_s21 }
 0x6c0   : > { %s2471_s10 = scalar_lea.vmem %s3222_s15, 512  ;;  %s2648_s14 = smov [#allocation14]  }
 0x6c1   : > { %p2472_p6 = scmp.ne.s32.totalorder %s3222_s15, %s2471_s10  ;;  %s2475_s11 = sshll.u32 %s2648_s14, 4  ;;  %s2476_s11 = int_to_ptr.vmem [resolvable:$false] %s2475_s11 }
 0x6c2   : > { %s2477_s18 = scalar_lea.vmem %s2476_s11, 1024  ;;  %p2478_p2 = scmp.lt.s32.totalorder %s3222_s15, %s2476_s11 }
 0x6c3   : > { %s2065_s20 = sshll.u32 %s3377_s2, 2  ;;  %p2479_p8 = scmp.lt.s32.totalorder %s2477_s18, %s2471_s10 }
 0x6c4   : > { %s1884_s25 = sadd.s32 %s2065_s20, %s1879_s27  ;;  %p3382_p11 = scmp.ne.s32.totalorder %s3379_s8, 0 }
 0x6c5   : > { %s2066_s22 = sshll.u32 %s1884_s25, 7  ;;  %s3381_s3 = smov %s3380_s23 }
 0x6c6   : > { %s3227_s13 = scalar_lea.hbm %s3380_s23, %s2066_s22  ;;  %p2473_p0 = pnand %p2472_p6, %p3382_p11 }
 0x6c7   : > { %p2480_p9 = por %p2479_p8, %p2478_p2 }
 0x6c8   : > { %p2474_p10 = pneg %p2473_p0 }
 0x6ca   : > { %p2481_p13 = pnand %p2480_p9, %p2474_p10 }
 0x6cc   : > { %2484 = shalt.err (!%p2481_p13)
}
 0x6cd   : > { %s2485_s21 = scalar_lea.hbm %s3227_s13, 512  ;;  %s2489_s2 = scalar_lea.hbm %s3381_s3, 1024 }
 0x6ce   : > { %p2486_p5 = scmp.ne.s32.totalorder %s3227_s13, %s2485_s21  ;;  %p2490_p4 = scmp.lt.u32.totalorder %s3227_s13, %s3381_s3 }
 0x6cf   : > { %p2491_p12 = scmp.lt.u32.totalorder %s2489_s2, %s2485_s21  ;;  %p2493_p6 = scmp.lt.u32.totalorder %s2485_s21, %s3227_s13 }
 0x6d0   : > { %p2487_p3 = pnand %p2486_p5, %p3382_p11 }
 0x6d1   : > { %p2492_p1 = por %p2491_p12, %p2490_p4 }
 0x6d2   : > { %p2488_p7 = pneg %p2487_p3 }
 0x6d3   : > { %p2494_p0 = por %p2493_p6, %p2492_p1 }
 0x6d5   : > { %p2495_p10 = pnand %p2494_p0, %p2488_p7 }
 0x6d7   : > { %2498 = shalt.err (!%p2495_p10)
}
 0x6d8   : > { %s2649_s25 = smov 128   ;;  %s2650_s22 = smov 8  }
 0x6d9   : > { %2187 = dma.vmem_to_hbm [thread:$0]  (%p3382_p11), %s3222_s15, 512, %s3227_s13, %s3231_s5, %s2649_s25, %s2649_s25, %s2650_s22  }
 0x6da PF: > { %s3383_s7 = sld [smem:[#allocation19_spill]]  ;;  %p3384_p2 = scmp.ne.s32.totalorder %s3353_s12, 0 }
 0x6db   : > { %p3385_p8 = scmp.ge.s32.totalorder %s2633_s9, 2 }
 0x6dd   : > { %p2200_p9 = pnand %p3385_p8, %p3384_p2 }
 0x6e0   : > { %s1902_s16 = sand.u32 1, %s3383_s7  }
 0x6e1   : > { %s1903_s23 = scalar_lea.sflag [#allocation10], %s1902_s16 }
 0x6e2   : > { %2572 = dma.done.wait (!%p2200_p9), %s1903_s23, 512  }
 0x6e3   : > { %2574 = vsyncadd (!%p2200_p9), %s1903_s23, 4294966784  ;;  %s26_s9 = sadd.s32 1, %s2633_s9   ;;  %s3387_s22 = sld [smem:[#allocation20_spill]] }
 0x6e4   : > { %p3261_p13 = scmp.ge.s32.totalorder %s26_s9, 4   ;;  %s3388_s23 = sld [smem:[#allocation21_spill]] }
 0x6e5   : > { %s3389_s24 = sld [smem:[#allocation25_spill]]  ;;  %s3390_s12 = sld [smem:[#allocation26_spill]] }
 0x6e6   : > { %s3391_s7 = sld [smem:[#allocation23_spill]]  ;;  %s3392_s8 = sld [smem:[#allocation24_spill]] }
 0x6e7   : > { %s3393_s25 = smov %s2593_s26  ;;  %s3394_s26 = smov %s2597_s0 }
 0x6e8   : > { %s3395_s0 = smov %s2955_s29  ;;  %s3396_s27 = smov %s2605_s1 }
 0x6e9   : > { %s3397_s1 = smov %s2609_s28  ;;  %s3399_s29 = smov %s2617_s30 }
 0x6ea   : > { %s3400_s30 = smov %s2621_s6  ;;  %s3401_s6 = smov %s2889_s17 }
 0x6eb   : > { %s3398_s28 = smov %s3390_s12  ;;  %25 = sbr.rel (!%p3261_p13) target bundleno = 19 (0x13), region = 113 }
 0x6f2   :  { %1908 = vsyncpa [#allocation9], 1 }
 0x6f3   :  { %1910 = vsyncpa [#allocation9 + $0x1], 1 }
 0x6f4   :  { %1911 = vsyncpa [#allocation12], 1 }
 0x6f5   :  { %1913 = vsyncpa [#allocation12 + $0x1], 1 }
 0x6f6   :  { %1914 = vsyncpa [#allocation10], 1 }
 0x6f7   :  { %1916 = vsyncpa [#allocation10 + $0x1], 1 }

</bundles_post_ra>
